<compile_context>
chip_gen: v7x
topology: tpu7x:2x2x1
jax: 0.10.0
libtpu: 0.0.40
codegen_flags: <defaults>
</compile_context>

<pallas_src>
import math
import functools

import jax
import jax.numpy as jnp
from jax.experimental import pallas as pl
from jax.experimental.pallas import tpu as pltpu

LN_EPS = 1e-12        # matches the reference LayerNorm class default (not nn.LayerNorm's 1e-5)
MASK_NEG = -1e9       # finite "minus infinity": fully-masked rows give uniform attn, not NaN
VMEM_LIMIT = 48 * 1024 * 1024   # raise 16/32 MiB default scoped limit; < v7x 64 MiB physical


# ----------------------------------------------------------------------------
# Pallas kernels
# ----------------------------------------------------------------------------

def _layernorm(z, g, b, eps):
    # LayerNorm over the last dim, biased variance (matches torch var(unbiased=False)).
    mean = jnp.mean(z, axis=-1, keepdims=True)
    var = jnp.mean((z - mean) ** 2, axis=-1, keepdims=True)
    return g * ((z - mean) * jax.lax.rsqrt(var + eps)) + b


def _mha_block_kernel(x_ref, kv_ref, bias_ref,
                      wq_ref, bq_ref, wk_ref, bk_ref, wv_ref, bv_ref,
                      wo_ref, bo_ref, g_ref, beta_ref, o_ref,
                      *, n_heads, eps):
    """One (batch, Lq-tile): MultiHeadAttention(x, kv, kv) + out-proj + residual + LayerNorm.

    x:    [tq, D]  f32   query tile (also the residual)
    kv:   [Lk, D]  f32   key/value input (x for self-attn, encoder memory for cross-attn)
    bias: [tq, Lk] bf16  additive mask (0 or -1e9)
    wq/wk/wv: [D, D] bf16 (wq pre-scaled by 1/sqrt(dh)); bq/bk/bv: [1, D] f32
    wo:   [H, dh, D] bf16; bo/gamma/beta: [1, D] f32
    """
    x = x_ref[...]                                   # f32, kept for residual + LN
    bias = bias_ref[...].astype(jnp.float32)         # [tq, Lk]

    xb = x.astype(jnp.bfloat16)
    kvb = kv_ref[...].astype(jnp.bfloat16)

    # Lane-dense QKV projections: bf16 operands, f32 accumulation on the MXU.
    q = jnp.dot(xb, wq_ref[...], preferred_element_type=jnp.float32) + bq_ref[...]
    k = jnp.dot(kvb, wk_ref[...], preferred_element_type=jnp.float32) + bk_ref[...]
    v = jnp.dot(kvb, wv_ref[...], preferred_element_type=jnp.float32) + bv_ref[...]

    d_model = q.shape[-1]
    dh = d_model // n_heads

    # Per-head score/context matmuls (inherently dh-wide contraction).  The output
    # projection is folded into the loop so the accumulator stays lane-dense [tq, D].
    # TODO(synk): for H >= 8 at long Lq, switch to an Lk-reduction (flash-style) grid
    # axis with online softmax instead of whole-Lk scores per head.
    acc = jnp.zeros((x.shape[0], d_model), jnp.float32)
    for h in range(n_heads):                         # static unroll; H temporaries die per iter
        sl = slice(h * dh, (h + 1) * dh)
        qh = q[:, sl].astype(jnp.bfloat16)
        kh = k[:, sl].astype(jnp.bfloat16)
        vh = v[:, sl].astype(jnp.bfloat16)
        # qh @ kh^T without materializing a transpose (contract last axes).
        s = jax.lax.dot_general(qh, kh, (((1,), (1,)), ((), ())),
                                preferred_element_type=jnp.float32)      # [tq, Lk]
        s = s + bias                                  # scale already folded into Wq
        s = s - jnp.max(s, axis=-1, keepdims=True)
        p = jnp.exp(s)                                # f32 softmax math (v5e has no bf16 VPU/EUP)
        p = p * pl.reciprocal(jnp.sum(p, axis=-1, keepdims=True), approx=True)
        ctx_h = jnp.dot(p.astype(jnp.bfloat16), vh,
                        preferred_element_type=jnp.float32)              # [tq, dh]
        acc = acc + jnp.dot(ctx_h.astype(jnp.bfloat16), wo_ref[h],
                            preferred_element_type=jnp.float32)          # [tq, D]

    y = acc + bo_ref[...]
    o_ref[...] = _layernorm(x + y, g_ref[...], beta_ref[...], eps)


def _ffn_ln_kernel(x_ref, w1_ref, b1_ref, w2_ref, b2_ref, g_ref, beta_ref,
                   o_ref, acc_ref, *, eps):
    """relu(x @ W1 + b1) @ W2 accumulated over d_ff tiles; +b2, +residual, +LayerNorm at the end."""
    j = pl.program_id(1)

    @pl.when(j == 0)
    def _():
        acc_ref[...] = jnp.zeros_like(acc_ref)

    xb = x_ref[...].astype(jnp.bfloat16)
    h = jnp.dot(xb, w1_ref[...], preferred_element_type=jnp.float32) + b1_ref[...]
    h = jnp.maximum(h, 0.0)
    acc_ref[...] += jnp.dot(h.astype(jnp.bfloat16), w2_ref[...],
                            preferred_element_type=jnp.float32)

    @pl.when(j == pl.num_programs(1) - 1)
    def _():
        y = acc_ref[...] + b2_ref[...]
        o_ref[...] = _layernorm(x_ref[...] + y, g_ref[...], beta_ref[...], eps)


# ----------------------------------------------------------------------------
# Kernel wrappers
# ----------------------------------------------------------------------------

def _pick_seq_tile(L):
    for t in (256, 128):
        if L % t == 0:
            return t
    return L


def mha_block(q_in, kv_in, bias, p, gamma, beta, n_heads, eps=LN_EPS):
    """Fused multi-head attention block. q_in: [B, Lq, D], kv_in: [B, Lk, D],
    bias: [B, Lq, Lk] bf16 additive mask. Returns LayerNorm(q_in + MHA(...)) [B, Lq, D]."""
    B, Lq, D = q_in.shape
    Lk = kv_in.shape[1]
    H = n_heads
    dh = D // H
    tq = _pick_seq_tile(Lq)

    kernel = functools.partial(_mha_block_kernel, n_heads=H, eps=eps)
    return pl.pallas_call(
        kernel,
        out_shape=jax.ShapeDtypeStruct((B, Lq, D), jnp.float32),
        grid=(B, Lq // tq),
        in_specs=[
            pl.BlockSpec((None, tq, D), lambda b, i: (b, i, 0)),    # q_in tile (also residual)
            pl.BlockSpec((None, Lk, D), lambda b, i: (b, 0, 0)),    # kv_in (resident per batch)
            pl.BlockSpec((None, tq, Lk), lambda b, i: (b, i, 0)),   # additive mask bias (bf16)
            pl.BlockSpec((D, D), lambda b, i: (0, 0)),              # Wq (scale folded in)
            pl.BlockSpec((1, D), lambda b, i: (0, 0)),              # bq
            pl.BlockSpec((D, D), lambda b, i: (0, 0)),              # Wk
            pl.BlockSpec((1, D), lambda b, i: (0, 0)),              # bk
            pl.BlockSpec((D, D), lambda b, i: (0, 0)),              # Wv
            pl.BlockSpec((1, D), lambda b, i: (0, 0)),              # bv
            pl.BlockSpec((H, dh, D), lambda b, i: (0, 0, 0)),       # Wo per-head row blocks
            pl.BlockSpec((1, D), lambda b, i: (0, 0)),              # bo
            pl.BlockSpec((1, D), lambda b, i: (0, 0)),              # gamma
            pl.BlockSpec((1, D), lambda b, i: (0, 0)),              # beta
        ],
        out_specs=pl.BlockSpec((None, tq, D), lambda b, i: (b, i, 0)),
        compiler_params=pltpu.CompilerParams(
            dimension_semantics=("parallel", "parallel"),
            vmem_limit_bytes=VMEM_LIMIT),
    )(q_in, kv_in, bias,
      p["wq"], p["bq"], p["wk"], p["bk"], p["wv"], p["bv"],
      p["wo"], p["bo"], gamma, beta)


def _pick_row_tile(M):
    # Largest row tile <= 256 that divides M (256 keeps the live set comfortable on
    # v7x's 64 MiB VMEM while still amortizing the ~0.35 us per-grid-step overhead).
    for t in (256, 128, 64, 32, 16, 8):
        if M % t == 0:
            return t
    return M


def _pick_dff_tile(dff):
    for t in (1024, 512):
        if dff % t == 0:
            return t
    return dff


def ffn_ln_block(x, w1, b1, w2, b2, gamma, beta, eps=LN_EPS):
    """Fused position-wise FFN + residual + LayerNorm. x: [B, L, D]."""
    B, L, D = x.shape
    M = B * L
    Dff = w1.shape[1]
    x2 = x.reshape(M, D)
    tm = _pick_row_tile(M)
    tdff = _pick_dff_tile(Dff)

    kernel = functools.partial(_ffn_ln_kernel, eps=eps)
    out = pl.pallas_call(
        kernel,
        out_shape=jax.ShapeDtypeStruct((M, D), jnp.float32),
        grid=(M // tm, Dff // tdff),
        in_specs=[
            pl.BlockSpec((tm, D), lambda i, j: (i, 0)),      # activation tile (also residual)
            pl.BlockSpec((D, tdff), lambda i, j: (0, j)),    # W1 d_ff tile
            pl.BlockSpec((1, tdff), lambda i, j: (0, j)),    # b1 d_ff tile
            pl.BlockSpec((tdff, D), lambda i, j: (j, 0)),    # W2 d_ff tile
            pl.BlockSpec((1, D), lambda i, j: (0, 0)),       # b2
            pl.BlockSpec((1, D), lambda i, j: (0, 0)),       # gamma
            pl.BlockSpec((1, D), lambda i, j: (0, 0)),       # beta
        ],
        out_specs=pl.BlockSpec((tm, D), lambda i, j: (i, 0)),
        scratch_shapes=[pltpu.VMEM((tm, D), jnp.float32)],   # f32 accumulator over d_ff tiles
        compiler_params=pltpu.CompilerParams(
            dimension_semantics=("parallel", "arbitrary"),
            vmem_limit_bytes=VMEM_LIMIT),
    )(x2, w1, b1, w2, b2, gamma, beta)
    return out.reshape(B, L, D)


# ----------------------------------------------------------------------------
# Decoder forward
# ----------------------------------------------------------------------------

def decoder_layer(dec_inputs, enc_outputs, self_bias, cross_bias, p, n_heads):
    # self attention + residual + LN (one fused kernel)
    x1 = mha_block(dec_inputs, dec_inputs, self_bias, p["self_attn"],
                   p["ln1_g"], p["ln1_b"], n_heads)
    # cross attention + residual + LN (one fused kernel)
    x2 = mha_block(x1, enc_outputs, cross_bias, p["cross_attn"],
                   p["ln2_g"], p["ln2_b"], n_heads)
    # position-wise FFN + residual + LN (one fused kernel)
    x3 = ffn_ln_block(x2, p["w1"], p["b1"], p["w2"], p["b2"], p["ln3_g"], p["ln3_b"])
    return x3


@functools.partial(jax.jit, static_argnames=("n_heads",))
def decoder_forward(dec_inputs, enc_outputs, dec_self_attn_mask,
                    dec_self_attn_subsequence_mask, memory_self_attn_mask,
                    params, *, n_heads):
    # matches: dec_self_attn_mask = torch.gt(pad_mask + subsequence_mask, 0)
    # Converted ONCE to bf16 additive biases (0 / -1e9): halves HBM traffic for the
    # [B,Lq,Lk] mask, which is re-read by every attention of every layer.
    self_masked = (dec_self_attn_mask + dec_self_attn_subsequence_mask) > 0
    self_bias = jnp.where(self_masked, MASK_NEG, 0.0).astype(jnp.bfloat16)
    cross_bias = jnp.where(memory_self_attn_mask != 0, MASK_NEG, 0.0).astype(jnp.bfloat16)

    output = dec_inputs
    for layer_p in params:
        output = decoder_layer(output, enc_outputs, self_bias, cross_bias,
                               layer_p, n_heads)
    return output


# ----------------------------------------------------------------------------
# Deterministic parameter init (synthetic; shapes follow nn.Module __init__)
# ----------------------------------------------------------------------------

def _init_linear(key, din, dout, scale=0.05):
    kw, kb = jax.random.split(key)
    w = jax.random.normal(kw, (din, dout), jnp.float32) * scale   # [D_in, D_out]
    b = jax.random.normal(kb, (dout,), jnp.float32) * scale
    return w, b


def _init_mha(key, d_model, n_heads):
    dh = d_model // n_heads
    ks = jax.random.split(key, 4)
    wq, bq = _init_linear(ks[0], d_model, d_model)
    wk, bk = _init_linear(ks[1], d_model, d_model)
    wv, bv = _init_linear(ks[2], d_model, d_model)
    wo, bo = _init_linear(ks[3], d_model, d_model)
    scale = 1.0 / math.sqrt(dh)
    # Weights kept lane-dense [D, D] in bf16 (MXU operands); the 1/sqrt(dh) attention
    # scale is folded into Wq/bq (mathematically identical to scaling the scores).
    # W_O is stored per-head [H, dh, D] so the output projection folds into the head loop.
    return dict(
        wq=(wq * scale).astype(jnp.bfloat16), bq=(bq * scale).reshape(1, d_model),
        wk=wk.astype(jnp.bfloat16), bk=bk.reshape(1, d_model),
        wv=wv.astype(jnp.bfloat16), bv=bv.reshape(1, d_model),
        wo=wo.reshape(n_heads, dh, d_model).astype(jnp.bfloat16),
        bo=bo.reshape(1, d_model),
    )


def init_decoder_params(key, n_layers, d_model, d_ff, n_heads):
    params = []
    for lk in jax.random.split(key, n_layers):
        k1, k2, k3, k4 = jax.random.split(lk, 4)
        w1, b1 = _init_linear(k3, d_model, d_ff)
        w2, b2 = _init_linear(k4, d_ff, d_model)
        params.append(dict(
            self_attn=_init_mha(k1, d_model, n_heads),
            cross_attn=_init_mha(k2, d_model, n_heads),
            w1=w1.astype(jnp.bfloat16), b1=b1.reshape(1, d_ff),
            w2=w2.astype(jnp.bfloat16), b2=b2.reshape(1, d_model),
            ln1_g=jnp.ones((1, d_model), jnp.float32),
            ln1_b=jnp.zeros((1, d_model), jnp.float32),
            ln2_g=jnp.ones((1, d_model), jnp.float32),
            ln2_b=jnp.zeros((1, d_model), jnp.float32),
            ln3_g=jnp.ones((1, d_model), jnp.float32),
            ln3_b=jnp.zeros((1, d_model), jnp.float32),
        ))
    return params


# ----------------------------------------------------------------------------
# Demo
# ----------------------------------------------------------------------------

if __name__ == "__main__":
    # small shapes consistent with the module's forward
    B, TGT, SRC = 2, 8, 8
    D_MODEL, D_FF, N_HEADS, N_LAYERS = 32, 64, 4, 2

    key = jax.random.PRNGKey(0)
    k_dec, k_enc, k_par = jax.random.split(key, 3)

    # NOTE: Decoder's docstring says dec_inputs is [B, tgt_len] token ids, but the
    # code passes it straight into DecoderLayer as [B, tgt_len, d_model]; we follow
    # the code (already-embedded inputs).
    dec_inputs = jax.random.normal(k_dec, (B, TGT, D_MODEL), jnp.float32)
    enc_outputs = jax.random.normal(k_enc, (B, SRC, D_MODEL), jnp.float32)

    # padding mask (no padding), causal subsequence mask, and memory mask
    dec_self_attn_mask = jnp.zeros((B, TGT, TGT), jnp.int32)
    dec_self_attn_subsequence_mask = jnp.broadcast_to(
        jnp.triu(jnp.ones((TGT, TGT), jnp.int32), k=1), (B, TGT, TGT)
    )
    memory_self_attn_mask = jnp.zeros((B, TGT, SRC), jnp.int32)

    params = init_decoder_params(k_par, N_LAYERS, D_MODEL, D_FF, N_HEADS)

    out = decoder_forward(
        dec_inputs, enc_outputs,
        dec_self_attn_mask, dec_self_attn_subsequence_mask, memory_self_attn_mask,
        params, n_heads=N_HEADS,
    )
    jax.block_until_ready(out)
    assert out.shape == (B, TGT, D_MODEL)
    assert bool(jnp.all(jnp.isfinite(out)))
    print("KERNEL_OK")
</pallas_src>

<mosaic_0001>
module attributes {stable_mosaic.version = 11 : i64} {
  func.func @_mha_block_kernel(%arg0: i32, %arg1: i32, %arg2: memref<1x8x32xf32, #tpu.memory_space<vmem>>, %arg3: memref<1x8x32xf32, #tpu.memory_space<vmem>>, %arg4: memref<1x8x8xbf16, #tpu.memory_space<vmem>>, %arg5: memref<32x32xbf16, #tpu.memory_space<vmem>>, %arg6: memref<1x32xf32, #tpu.memory_space<vmem>>, %arg7: memref<32x32xbf16, #tpu.memory_space<vmem>>, %arg8: memref<1x32xf32, #tpu.memory_space<vmem>>, %arg9: memref<32x32xbf16, #tpu.memory_space<vmem>>, %arg10: memref<1x32xf32, #tpu.memory_space<vmem>>, %arg11: memref<4x8x32xbf16, #tpu.memory_space<vmem>>, %arg12: memref<1x32xf32, #tpu.memory_space<vmem>>, %arg13: memref<1x32xf32, #tpu.memory_space<vmem>>, %arg14: memref<1x32xf32, #tpu.memory_space<vmem>>, %arg15: memref<1x8x32xf32, #tpu.memory_space<vmem>>) attributes {dimension_semantics = [#tpu.dimension_semantics<parallel>, #tpu.dimension_semantics<parallel>], iteration_bounds = array<i64: 2, 1>, scalar_prefetch = 0 : i64, scratch_operands = 0 : i64, tpu.core_type = #tpu.core_type<tc>, window_params = [{transform_indices = @transform_0, window_bounds = array<i64: 1, 8, 32>}, {transform_indices = @transform_1, window_bounds = array<i64: 1, 8, 32>}, {transform_indices = @transform_2, window_bounds = array<i64: 1, 8, 8>}, {pipeline_mode = #tpu.pipeline_mode<synchronous>, transform_indices = @transform_3, window_bounds = array<i64: 32, 32>}, {pipeline_mode = #tpu.pipeline_mode<synchronous>, transform_indices = @transform_4, window_bounds = array<i64: 1, 32>}, {pipeline_mode = #tpu.pipeline_mode<synchronous>, transform_indices = @transform_5, window_bounds = array<i64: 32, 32>}, {pipeline_mode = #tpu.pipeline_mode<synchronous>, transform_indices = @transform_6, window_bounds = array<i64: 1, 32>}, {pipeline_mode = #tpu.pipeline_mode<synchronous>, transform_indices = @transform_7, window_bounds = array<i64: 32, 32>}, {pipeline_mode = #tpu.pipeline_mode<synchronous>, transform_indices = @transform_8, window_bounds = array<i64: 1, 32>}, {pipeline_mode = #tpu.pipeline_mode<synchronous>, transform_indices = @transform_9, window_bounds = array<i64: 4, 8, 32>}, {pipeline_mode = #tpu.pipeline_mode<synchronous>, transform_indices = @transform_10, window_bounds = array<i64: 1, 32>}, {pipeline_mode = #tpu.pipeline_mode<synchronous>, transform_indices = @transform_11, window_bounds = array<i64: 1, 32>}, {pipeline_mode = #tpu.pipeline_mode<synchronous>, transform_indices = @transform_12, window_bounds = array<i64: 1, 32>}, {transform_indices = @transform_13, window_bounds = array<i64: 1, 8, 32>}]} {
    %c0 = arith.constant 0 : index
    %c0_0 = arith.constant 0 : index
    %c0_1 = arith.constant 0 : index
    %0 = vector.load %arg2[%c0, %c0_0, %c0_1] : memref<1x8x32xf32, #tpu.memory_space<vmem>>, vector<1x8x32xf32>
    %1 = vector.shape_cast %0 : vector<1x8x32xf32> to vector<8x32xf32>
    %c0_2 = arith.constant 0 : index
    %c0_3 = arith.constant 0 : index
    %c0_4 = arith.constant 0 : index
    %2 = vector.load %arg4[%c0_2, %c0_3, %c0_4] : memref<1x8x8xbf16, #tpu.memory_space<vmem>>, vector<1x8x8xbf16>
    %3 = vector.shape_cast %2 : vector<1x8x8xbf16> to vector<8x8xbf16>
    %4 = arith.extf %3 : vector<8x8xbf16> to vector<8x8xf32>
    %5 = arith.truncf %1 : vector<8x32xf32> to vector<8x32xbf16>
    %c0_5 = arith.constant 0 : index
    %c0_6 = arith.constant 0 : index
    %c0_7 = arith.constant 0 : index
    %6 = vector.load %arg3[%c0_5, %c0_6, %c0_7] : memref<1x8x32xf32, #tpu.memory_space<vmem>>, vector<1x8x32xf32>
    %7 = vector.shape_cast %6 : vector<1x8x32xf32> to vector<8x32xf32>
    %8 = arith.truncf %7 : vector<8x32xf32> to vector<8x32xbf16>
    %c0_8 = arith.constant 0 : index
    %c0_9 = arith.constant 0 : index
    %9 = vector.load %arg5[%c0_8, %c0_9] : memref<32x32xbf16, #tpu.memory_space<vmem>>, vector<32x32xbf16>
    %cst = arith.constant dense<0.000000e+00> : vector<8x32xf32>
    %10 = tpu.matmul %5, %9, %cst {dimension_numbers = #tpu.dot_dimension_numbers<[1], [0], [0], [1], [0, 0, 1, 1], [], []>} : vector<8x32xbf16>, vector<32x32xbf16>, vector<8x32xf32> -> vector<8x32xf32>
    %c0_10 = arith.constant 0 : index
    %c0_11 = arith.constant 0 : index
    %11 = vector.load %arg6[%c0_10, %c0_11] : memref<1x32xf32, #tpu.memory_space<vmem>>, vector<1x32xf32>
    %12 = vector.broadcast %11 : vector<1x32xf32> to vector<8x32xf32>
    %13 = arith.addf %10, %12 : vector<8x32xf32>
    %c0_12 = arith.constant 0 : index
    %c0_13 = arith.constant 0 : index
    %14 = vector.load %arg7[%c0_12, %c0_13] : memref<32x32xbf16, #tpu.memory_space<vmem>>, vector<32x32xbf16>
    %cst_14 = arith.constant dense<0.000000e+00> : vector<8x32xf32>
    %15 = tpu.matmul %8, %14, %cst_14 {dimension_numbers = #tpu.dot_dimension_numbers<[1], [0], [0], [1], [0, 0, 1, 1], [], []>} : vector<8x32xbf16>, vector<32x32xbf16>, vector<8x32xf32> -> vector<8x32xf32>
    %c0_15 = arith.constant 0 : index
    %c0_16 = arith.constant 0 : index
    %16 = vector.load %arg8[%c0_15, %c0_16] : memref<1x32xf32, #tpu.memory_space<vmem>>, vector<1x32xf32>
    %17 = vector.broadcast %16 : vector<1x32xf32> to vector<8x32xf32>
    %18 = arith.addf %15, %17 : vector<8x32xf32>
    %c0_17 = arith.constant 0 : index
    %c0_18 = arith.constant 0 : index
    %19 = vector.load %arg9[%c0_17, %c0_18] : memref<32x32xbf16, #tpu.memory_space<vmem>>, vector<32x32xbf16>
    %cst_19 = arith.constant dense<0.000000e+00> : vector<8x32xf32>
    %20 = tpu.matmul %8, %19, %cst_19 {dimension_numbers = #tpu.dot_dimension_numbers<[1], [0], [0], [1], [0, 0, 1, 1], [], []>} : vector<8x32xbf16>, vector<32x32xbf16>, vector<8x32xf32> -> vector<8x32xf32>
    %c0_20 = arith.constant 0 : index
    %c0_21 = arith.constant 0 : index
    %21 = vector.load %arg10[%c0_20, %c0_21] : memref<1x32xf32, #tpu.memory_space<vmem>>, vector<1x32xf32>
    %22 = vector.broadcast %21 : vector<1x32xf32> to vector<8x32xf32>
    %23 = arith.addf %20, %22 : vector<8x32xf32>
    %cst_22 = arith.constant 0.000000e+00 : f32
    %24 = vector.broadcast %cst_22 : f32 to vector<8x32xf32>
    %25 = vector.extract_strided_slice %13 {offsets = [0, 0], sizes = [8, 8], strides = [1, 1]} : vector<8x32xf32> to vector<8x8xf32>
    %26 = arith.truncf %25 : vector<8x8xf32> to vector<8x8xbf16>
    %27 = vector.extract_strided_slice %18 {offsets = [0, 0], sizes = [8, 8], strides = [1, 1]} : vector<8x32xf32> to vector<8x8xf32>
    %28 = arith.truncf %27 : vector<8x8xf32> to vector<8x8xbf16>
    %29 = vector.extract_strided_slice %23 {offsets = [0, 0], sizes = [8, 8], strides = [1, 1]} : vector<8x32xf32> to vector<8x8xf32>
    %30 = arith.truncf %29 : vector<8x8xf32> to vector<8x8xbf16>
    %cst_23 = arith.constant dense<0.000000e+00> : vector<8x8xf32>
    %31 = tpu.matmul %26, %28, %cst_23 {dimension_numbers = #tpu.dot_dimension_numbers<[1], [1], [0], [0], [0, 0, 1, 0], [], []>} : vector<8x8xbf16>, vector<8x8xbf16>, vector<8x8xf32> -> vector<8x8xf32>
    %32 = arith.addf %31, %4 : vector<8x8xf32>
    %cst_24 = arith.constant dense<0xFF800000> : vector<8xf32>
    %33 = vector.multi_reduction <maximumf>, %32, %cst_24 [1] : vector<8x8xf32> to vector<8xf32>
    %34 = vector.shape_cast %33 : vector<8xf32> to vector<8x1xf32>
    %35 = vector.broadcast %34 : vector<8x1xf32> to vector<8x8xf32>
    %36 = arith.subf %32, %35 : vector<8x8xf32>
    %37 = math.exp %36 : vector<8x8xf32>
    %cst_25 = arith.constant dense<0.000000e+00> : vector<8xf32>
    %38 = vector.multi_reduction <add>, %37, %cst_25 [1] : vector<8x8xf32> to vector<8xf32>
    %39 = vector.shape_cast %38 : vector<8xf32> to vector<8x1xf32>
    %40 = tpu.reciprocal %39 {approx = true} : vector<8x1xf32> -> vector<8x1xf32>
    %41 = vector.broadcast %40 : vector<8x1xf32> to vector<8x8xf32>
    %42 = arith.mulf %37, %41 : vector<8x8xf32>
    %43 = arith.truncf %42 : vector<8x8xf32> to vector<8x8xbf16>
    %cst_26 = arith.constant dense<0.000000e+00> : vector<8x8xf32>
    %44 = tpu.matmul %43, %30, %cst_26 {dimension_numbers = #tpu.dot_dimension_numbers<[1], [0], [0], [1], [0, 0, 1, 1], [], []>} : vector<8x8xbf16>, vector<8x8xbf16>, vector<8x8xf32> -> vector<8x8xf32>
    %45 = arith.truncf %44 : vector<8x8xf32> to vector<8x8xbf16>
    %c0_27 = arith.constant 0 : index
    %c0_28 = arith.constant 0 : index
    %c0_29 = arith.constant 0 : index
    %46 = vector.load %arg11[%c0_27, %c0_28, %c0_29] : memref<4x8x32xbf16, #tpu.memory_space<vmem>>, vector<1x8x32xbf16>
    %47 = vector.shape_cast %46 : vector<1x8x32xbf16> to vector<8x32xbf16>
    %cst_30 = arith.constant dense<0.000000e+00> : vector<8x32xf32>
    %48 = tpu.matmul %45, %47, %cst_30 {dimension_numbers = #tpu.dot_dimension_numbers<[1], [0], [0], [1], [0, 0, 1, 1], [], []>} : vector<8x8xbf16>, vector<8x32xbf16>, vector<8x32xf32> -> vector<8x32xf32>
    %49 = arith.addf %24, %48 : vector<8x32xf32>
    %50 = vector.extract_strided_slice %13 {offsets = [0, 8], sizes = [8, 8], strides = [1, 1]} : vector<8x32xf32> to vector<8x8xf32>
    %51 = arith.truncf %50 : vector<8x8xf32> to vector<8x8xbf16>
    %52 = vector.extract_strided_slice %18 {offsets = [0, 8], sizes = [8, 8], strides = [1, 1]} : vector<8x32xf32> to vector<8x8xf32>
    %53 = arith.truncf %52 : vector<8x8xf32> to vector<8x8xbf16>
    %54 = vector.extract_strided_slice %23 {offsets = [0, 8], sizes = [8, 8], strides = [1, 1]} : vector<8x32xf32> to vector<8x8xf32>
    %55 = arith.truncf %54 : vector<8x8xf32> to vector<8x8xbf16>
    %cst_31 = arith.constant dense<0.000000e+00> : vector<8x8xf32>
    %56 = tpu.matmul %51, %53, %cst_31 {dimension_numbers = #tpu.dot_dimension_numbers<[1], [1], [0], [0], [0, 0, 1, 0], [], []>} : vector<8x8xbf16>, vector<8x8xbf16>, vector<8x8xf32> -> vector<8x8xf32>
    %57 = arith.addf %56, %4 : vector<8x8xf32>
    %cst_32 = arith.constant dense<0xFF800000> : vector<8xf32>
    %58 = vector.multi_reduction <maximumf>, %57, %cst_32 [1] : vector<8x8xf32> to vector<8xf32>
    %59 = vector.shape_cast %58 : vector<8xf32> to vector<8x1xf32>
    %60 = vector.broadcast %59 : vector<8x1xf32> to vector<8x8xf32>
    %61 = arith.subf %57, %60 : vector<8x8xf32>
    %62 = math.exp %61 : vector<8x8xf32>
    %cst_33 = arith.constant dense<0.000000e+00> : vector<8xf32>
    %63 = vector.multi_reduction <add>, %62, %cst_33 [1] : vector<8x8xf32> to vector<8xf32>
    %64 = vector.shape_cast %63 : vector<8xf32> to vector<8x1xf32>
    %65 = tpu.reciprocal %64 {approx = true} : vector<8x1xf32> -> vector<8x1xf32>
    %66 = vector.broadcast %65 : vector<8x1xf32> to vector<8x8xf32>
    %67 = arith.mulf %62, %66 : vector<8x8xf32>
    %68 = arith.truncf %67 : vector<8x8xf32> to vector<8x8xbf16>
    %cst_34 = arith.constant dense<0.000000e+00> : vector<8x8xf32>
    %69 = tpu.matmul %68, %55, %cst_34 {dimension_numbers = #tpu.dot_dimension_numbers<[1], [0], [0], [1], [0, 0, 1, 1], [], []>} : vector<8x8xbf16>, vector<8x8xbf16>, vector<8x8xf32> -> vector<8x8xf32>
    %70 = arith.truncf %69 : vector<8x8xf32> to vector<8x8xbf16>
    %c1 = arith.constant 1 : index
    %c0_35 = arith.constant 0 : index
    %c0_36 = arith.constant 0 : index
    %71 = vector.load %arg11[%c1, %c0_35, %c0_36] : memref<4x8x32xbf16, #tpu.memory_space<vmem>>, vector<1x8x32xbf16>
    %72 = vector.shape_cast %71 : vector<1x8x32xbf16> to vector<8x32xbf16>
    %cst_37 = arith.constant dense<0.000000e+00> : vector<8x32xf32>
    %73 = tpu.matmul %70, %72, %cst_37 {dimension_numbers = #tpu.dot_dimension_numbers<[1], [0], [0], [1], [0, 0, 1, 1], [], []>} : vector<8x8xbf16>, vector<8x32xbf16>, vector<8x32xf32> -> vector<8x32xf32>
    %74 = arith.addf %49, %73 : vector<8x32xf32>
    %75 = vector.extract_strided_slice %13 {offsets = [0, 16], sizes = [8, 8], strides = [1, 1]} : vector<8x32xf32> to vector<8x8xf32>
    %76 = arith.truncf %75 : vector<8x8xf32> to vector<8x8xbf16>
    %77 = vector.extract_strided_slice %18 {offsets = [0, 16], sizes = [8, 8], strides = [1, 1]} : vector<8x32xf32> to vector<8x8xf32>
    %78 = arith.truncf %77 : vector<8x8xf32> to vector<8x8xbf16>
    %79 = vector.extract_strided_slice %23 {offsets = [0, 16], sizes = [8, 8], strides = [1, 1]} : vector<8x32xf32> to vector<8x8xf32>
    %80 = arith.truncf %79 : vector<8x8xf32> to vector<8x8xbf16>
    %cst_38 = arith.constant dense<0.000000e+00> : vector<8x8xf32>
    %81 = tpu.matmul %76, %78, %cst_38 {dimension_numbers = #tpu.dot_dimension_numbers<[1], [1], [0], [0], [0, 0, 1, 0], [], []>} : vector<8x8xbf16>, vector<8x8xbf16>, vector<8x8xf32> -> vector<8x8xf32>
    %82 = arith.addf %81, %4 : vector<8x8xf32>
    %cst_39 = arith.constant dense<0xFF800000> : vector<8xf32>
    %83 = vector.multi_reduction <maximumf>, %82, %cst_39 [1] : vector<8x8xf32> to vector<8xf32>
    %84 = vector.shape_cast %83 : vector<8xf32> to vector<8x1xf32>
    %85 = vector.broadcast %84 : vector<8x1xf32> to vector<8x8xf32>
    %86 = arith.subf %82, %85 : vector<8x8xf32>
    %87 = math.exp %86 : vector<8x8xf32>
    %cst_40 = arith.constant dense<0.000000e+00> : vector<8xf32>
    %88 = vector.multi_reduction <add>, %87, %cst_40 [1] : vector<8x8xf32> to vector<8xf32>
    %89 = vector.shape_cast %88 : vector<8xf32> to vector<8x1xf32>
    %90 = tpu.reciprocal %89 {approx = true} : vector<8x1xf32> -> vector<8x1xf32>
    %91 = vector.broadcast %90 : vector<8x1xf32> to vector<8x8xf32>
    %92 = arith.mulf %87, %91 : vector<8x8xf32>
    %93 = arith.truncf %92 : vector<8x8xf32> to vector<8x8xbf16>
    %cst_41 = arith.constant dense<0.000000e+00> : vector<8x8xf32>
    %94 = tpu.matmul %93, %80, %cst_41 {dimension_numbers = #tpu.dot_dimension_numbers<[1], [0], [0], [1], [0, 0, 1, 1], [], []>} : vector<8x8xbf16>, vector<8x8xbf16>, vector<8x8xf32> -> vector<8x8xf32>
    %95 = arith.truncf %94 : vector<8x8xf32> to vector<8x8xbf16>
    %c2 = arith.constant 2 : index
    %c0_42 = arith.constant 0 : index
    %c0_43 = arith.constant 0 : index
    %96 = vector.load %arg11[%c2, %c0_42, %c0_43] : memref<4x8x32xbf16, #tpu.memory_space<vmem>>, vector<1x8x32xbf16>
    %97 = vector.shape_cast %96 : vector<1x8x32xbf16> to vector<8x32xbf16>
    %cst_44 = arith.constant dense<0.000000e+00> : vector<8x32xf32>
    %98 = tpu.matmul %95, %97, %cst_44 {dimension_numbers = #tpu.dot_dimension_numbers<[1], [0], [0], [1], [0, 0, 1, 1], [], []>} : vector<8x8xbf16>, vector<8x32xbf16>, vector<8x32xf32> -> vector<8x32xf32>
    %99 = arith.addf %74, %98 : vector<8x32xf32>
    %100 = vector.extract_strided_slice %13 {offsets = [0, 24], sizes = [8, 8], strides = [1, 1]} : vector<8x32xf32> to vector<8x8xf32>
    %101 = arith.truncf %100 : vector<8x8xf32> to vector<8x8xbf16>
    %102 = vector.extract_strided_slice %18 {offsets = [0, 24], sizes = [8, 8], strides = [1, 1]} : vector<8x32xf32> to vector<8x8xf32>
    %103 = arith.truncf %102 : vector<8x8xf32> to vector<8x8xbf16>
    %104 = vector.extract_strided_slice %23 {offsets = [0, 24], sizes = [8, 8], strides = [1, 1]} : vector<8x32xf32> to vector<8x8xf32>
    %105 = arith.truncf %104 : vector<8x8xf32> to vector<8x8xbf16>
    %cst_45 = arith.constant dense<0.000000e+00> : vector<8x8xf32>
    %106 = tpu.matmul %101, %103, %cst_45 {dimension_numbers = #tpu.dot_dimension_numbers<[1], [1], [0], [0], [0, 0, 1, 0], [], []>} : vector<8x8xbf16>, vector<8x8xbf16>, vector<8x8xf32> -> vector<8x8xf32>
    %107 = arith.addf %106, %4 : vector<8x8xf32>
    %cst_46 = arith.constant dense<0xFF800000> : vector<8xf32>
    %108 = vector.multi_reduction <maximumf>, %107, %cst_46 [1] : vector<8x8xf32> to vector<8xf32>
    %109 = vector.shape_cast %108 : vector<8xf32> to vector<8x1xf32>
    %110 = vector.broadcast %109 : vector<8x1xf32> to vector<8x8xf32>
    %111 = arith.subf %107, %110 : vector<8x8xf32>
    %112 = math.exp %111 : vector<8x8xf32>
    %cst_47 = arith.constant dense<0.000000e+00> : vector<8xf32>
    %113 = vector.multi_reduction <add>, %112, %cst_47 [1] : vector<8x8xf32> to vector<8xf32>
    %114 = vector.shape_cast %113 : vector<8xf32> to vector<8x1xf32>
    %115 = tpu.reciprocal %114 {approx = true} : vector<8x1xf32> -> vector<8x1xf32>
    %116 = vector.broadcast %115 : vector<8x1xf32> to vector<8x8xf32>
    %117 = arith.mulf %112, %116 : vector<8x8xf32>
    %118 = arith.truncf %117 : vector<8x8xf32> to vector<8x8xbf16>
    %cst_48 = arith.constant dense<0.000000e+00> : vector<8x8xf32>
    %119 = tpu.matmul %118, %105, %cst_48 {dimension_numbers = #tpu.dot_dimension_numbers<[1], [0], [0], [1], [0, 0, 1, 1], [], []>} : vector<8x8xbf16>, vector<8x8xbf16>, vector<8x8xf32> -> vector<8x8xf32>
    %120 = arith.truncf %119 : vector<8x8xf32> to vector<8x8xbf16>
    %c3 = arith.constant 3 : index
    %c0_49 = arith.constant 0 : index
    %c0_50 = arith.constant 0 : index
    %121 = vector.load %arg11[%c3, %c0_49, %c0_50] : memref<4x8x32xbf16, #tpu.memory_space<vmem>>, vector<1x8x32xbf16>
    %122 = vector.shape_cast %121 : vector<1x8x32xbf16> to vector<8x32xbf16>
    %cst_51 = arith.constant dense<0.000000e+00> : vector<8x32xf32>
    %123 = tpu.matmul %120, %122, %cst_51 {dimension_numbers = #tpu.dot_dimension_numbers<[1], [0], [0], [1], [0, 0, 1, 1], [], []>} : vector<8x8xbf16>, vector<8x32xbf16>, vector<8x32xf32> -> vector<8x32xf32>
    %124 = arith.addf %99, %123 : vector<8x32xf32>
    %c0_52 = arith.constant 0 : index
    %c0_53 = arith.constant 0 : index
    %125 = vector.load %arg12[%c0_52, %c0_53] : memref<1x32xf32, #tpu.memory_space<vmem>>, vector<1x32xf32>
    %126 = vector.broadcast %125 : vector<1x32xf32> to vector<8x32xf32>
    %127 = arith.addf %124, %126 : vector<8x32xf32>
    %128 = arith.addf %1, %127 : vector<8x32xf32>
    %c0_54 = arith.constant 0 : index
    %c0_55 = arith.constant 0 : index
    %129 = vector.load %arg13[%c0_54, %c0_55] : memref<1x32xf32, #tpu.memory_space<vmem>>, vector<1x32xf32>
    %c0_56 = arith.constant 0 : index
    %c0_57 = arith.constant 0 : index
    %130 = vector.load %arg14[%c0_56, %c0_57] : memref<1x32xf32, #tpu.memory_space<vmem>>, vector<1x32xf32>
    %cst_58 = arith.constant dense<0.000000e+00> : vector<8xf32>
    %131 = vector.multi_reduction <add>, %128, %cst_58 [1] : vector<8x32xf32> to vector<8xf32>
    %132 = vector.shape_cast %131 : vector<8xf32> to vector<8x1xf32>
    %cst_59 = arith.constant 3.200000e+01 : f32
    %133 = vector.broadcast %cst_59 : f32 to vector<8x1xf32>
    %134 = arith.divf %132, %133 : vector<8x1xf32>
    %135 = vector.broadcast %134 : vector<8x1xf32> to vector<8x32xf32>
    %136 = arith.subf %128, %135 : vector<8x32xf32>
    %137 = arith.mulf %136, %136 : vector<8x32xf32>
    %cst_60 = arith.constant dense<0.000000e+00> : vector<8xf32>
    %138 = vector.multi_reduction <add>, %137, %cst_60 [1] : vector<8x32xf32> to vector<8xf32>
    %139 = vector.shape_cast %138 : vector<8xf32> to vector<8x1xf32>
    %cst_61 = arith.constant 3.200000e+01 : f32
    %140 = vector.broadcast %cst_61 : f32 to vector<8x1xf32>
    %141 = arith.divf %139, %140 : vector<8x1xf32>
    %142 = vector.broadcast %134 : vector<8x1xf32> to vector<8x32xf32>
    %143 = arith.subf %128, %142 : vector<8x32xf32>
    %cst_62 = arith.constant 9.99999996E-13 : f32
    %144 = vector.broadcast %cst_62 : f32 to vector<8x1xf32>
    %145 = arith.addf %141, %144 : vector<8x1xf32>
    %146 = math.rsqrt %145 : vector<8x1xf32>
    %147 = vector.broadcast %146 : vector<8x1xf32> to vector<8x32xf32>
    %148 = arith.mulf %143, %147 : vector<8x32xf32>
    %149 = vector.broadcast %129 : vector<1x32xf32> to vector<8x32xf32>
    %150 = arith.mulf %149, %148 : vector<8x32xf32>
    %151 = vector.broadcast %130 : vector<1x32xf32> to vector<8x32xf32>
    %152 = arith.addf %150, %151 : vector<8x32xf32>
    %c0_63 = arith.constant 0 : index
    %c0_64 = arith.constant 0 : index
    %c0_65 = arith.constant 0 : index
    %153 = vector.load %arg15[%c0_63, %c0_64, %c0_65] : memref<1x8x32xf32, #tpu.memory_space<vmem>>, vector<1x8x32xf32>
    %154 = vector.shape_cast %153 : vector<1x8x32xf32> to vector<8x32xf32>
    %155 = vector.shape_cast %152 : vector<8x32xf32> to vector<1x8x32xf32>
    tpu.vector_store %arg15[%c0_63, %c0_64, %c0_65], %155 {strides = array<i32>} : memref<1x8x32xf32, #tpu.memory_space<vmem>>, vector<1x8x32xf32>,
    return
  }
  func.func @transform_0(%arg0: i32, %arg1: i32) -> (i32, i32, i32) {
    %c0_i32 = arith.constant 0 : i32
    %c0_i32_0 = arith.constant 0 : i32
    return %arg0, %arg1, %c0_i32 : i32, i32, i32
  }
  func.func @transform_1(%arg0: i32, %arg1: i32) -> (i32, i32, i32) {
    %c0_i32 = arith.constant 0 : i32
    %c0_i32_0 = arith.constant 0 : i32
    %c0_i32_1 = arith.constant 0 : i32
    return %arg0, %c0_i32, %c0_i32_0 : i32, i32, i32
  }
  func.func @transform_2(%arg0: i32, %arg1: i32) -> (i32, i32, i32) {
    %c0_i32 = arith.constant 0 : i32
    %c0_i32_0 = arith.constant 0 : i32
    return %arg0, %arg1, %c0_i32 : i32, i32, i32
  }
  func.func @transform_3(%arg0: i32, %arg1: i32) -> (i32, i32) {
    %c0_i32 = arith.constant 0 : i32
    %c0_i32_0 = arith.constant 0 : i32
    %c0_i32_1 = arith.constant 0 : i32
    return %c0_i32, %c0_i32_0 : i32, i32
  }
  func.func @transform_4(%arg0: i32, %arg1: i32) -> (i32, i32) {
    %c0_i32 = arith.constant 0 : i32
    %c0_i32_0 = arith.constant 0 : i32
    %c0_i32_1 = arith.constant 0 : i32
    return %c0_i32, %c0_i32_0 : i32, i32
  }
  func.func @transform_5(%arg0: i32, %arg1: i32) -> (i32, i32) {
    %c0_i32 = arith.constant 0 : i32
    %c0_i32_0 = arith.constant 0 : i32
    %c0_i32_1 = arith.constant 0 : i32
    return %c0_i32, %c0_i32_0 : i32, i32
  }
  func.func @transform_6(%arg0: i32, %arg1: i32) -> (i32, i32) {
    %c0_i32 = arith.constant 0 : i32
    %c0_i32_0 = arith.constant 0 : i32
    %c0_i32_1 = arith.constant 0 : i32
    return %c0_i32, %c0_i32_0 : i32, i32
  }
  func.func @transform_7(%arg0: i32, %arg1: i32) -> (i32, i32) {
    %c0_i32 = arith.constant 0 : i32
    %c0_i32_0 = arith.constant 0 : i32
    %c0_i32_1 = arith.constant 0 : i32
    return %c0_i32, %c0_i32_0 : i32, i32
  }
  func.func @transform_8(%arg0: i32, %arg1: i32) -> (i32, i32) {
    %c0_i32 = arith.constant 0 : i32
    %c0_i32_0 = arith.constant 0 : i32
    %c0_i32_1 = arith.constant 0 : i32
    return %c0_i32, %c0_i32_0 : i32, i32
  }
  func.func @transform_9(%arg0: i32, %arg1: i32) -> (i32, i32, i32) {
    %c0_i32 = arith.constant 0 : i32
    %c0_i32_0 = arith.constant 0 : i32
    %c0_i32_1 = arith.constant 0 : i32
    %c0_i32_2 = arith.constant 0 : i32
    return %c0_i32, %c0_i32_0, %c0_i32_1 : i32, i32, i32
  }
  func.func @transform_10(%arg0: i32, %arg1: i32) -> (i32, i32) {
    %c0_i32 = arith.constant 0 : i32
    %c0_i32_0 = arith.constant 0 : i32
    %c0_i32_1 = arith.constant 0 : i32
    return %c0_i32, %c0_i32_0 : i32, i32
  }
  func.func @transform_11(%arg0: i32, %arg1: i32) -> (i32, i32) {
    %c0_i32 = arith.constant 0 : i32
    %c0_i32_0 = arith.constant 0 : i32
    %c0_i32_1 = arith.constant 0 : i32
    return %c0_i32, %c0_i32_0 : i32, i32
  }
  func.func @transform_12(%arg0: i32, %arg1: i32) -> (i32, i32) {
    %c0_i32 = arith.constant 0 : i32
    %c0_i32_0 = arith.constant 0 : i32
    %c0_i32_1 = arith.constant 0 : i32
    return %c0_i32, %c0_i32_0 : i32, i32
  }
  func.func @transform_13(%arg0: i32, %arg1: i32) -> (i32, i32, i32) {
    %c0_i32 = arith.constant 0 : i32
    %c0_i32_0 = arith.constant 0 : i32
    return %arg0, %arg1, %c0_i32 : i32, i32, i32
  }
}

module attributes {stable_mosaic.version = 11 : i64} {
  func.func @_ffn_ln_kernel(%arg0: i32, %arg1: i32, %arg2: memref<16x32xf32, #tpu.memory_space<vmem>>, %arg3: memref<32x64xbf16, #tpu.memory_space<vmem>>, %arg4: memref<1x64xf32, #tpu.memory_space<vmem>>, %arg5: memref<64x32xbf16, #tpu.memory_space<vmem>>, %arg6: memref<1x32xf32, #tpu.memory_space<vmem>>, %arg7: memref<1x32xf32, #tpu.memory_space<vmem>>, %arg8: memref<1x32xf32, #tpu.memory_space<vmem>>, %arg9: memref<16x32xf32, #tpu.memory_space<vmem>>, %arg10: memref<16x32xf32, #tpu.memory_space<vmem>>) attributes {dimension_semantics = [#tpu.dimension_semantics<parallel>, #tpu.dimension_semantics<arbitrary>], iteration_bounds = array<i64: 1, 1>, scalar_prefetch = 0 : i64, scratch_operands = 1 : i64, tpu.core_type = #tpu.core_type<tc>, window_params = [{transform_indices = @transform_0, window_bounds = array<i64: 16, 32>}, {transform_indices = @transform_1, window_bounds = array<i64: 32, 64>}, {transform_indices = @transform_2, window_bounds = array<i64: 1, 64>}, {transform_indices = @transform_3, window_bounds = array<i64: 64, 32>}, {pipeline_mode = #tpu.pipeline_mode<synchronous>, transform_indices = @transform_4, window_bounds = array<i64: 1, 32>}, {pipeline_mode = #tpu.pipeline_mode<synchronous>, transform_indices = @transform_5, window_bounds = array<i64: 1, 32>}, {pipeline_mode = #tpu.pipeline_mode<synchronous>, transform_indices = @transform_6, window_bounds = array<i64: 1, 32>}, {transform_indices = @transform_7, window_bounds = array<i64: 16, 32>}]} {
    %c0_i32 = arith.constant 0 : i32
    %0 = arith.cmpi eq, %arg1, %c0_i32 : i32
    %1 = arith.extui %0 : i1 to i32
    %c0_i32_0 = arith.constant 0 : i32
    %2 = arith.cmpi ne, %1, %c0_i32_0 : i32
    scf.if %2 {
      %cst_16 = arith.constant 0.000000e+00 : f32
      %21 = vector.broadcast %cst_16 : f32 to vector<16x32xf32>
      %c0_17 = arith.constant 0 : index
      %c0_18 = arith.constant 0 : index
      %22 = vector.load %arg10[%c0_17, %c0_18] : memref<16x32xf32, #tpu.memory_space<vmem>>, vector<16x32xf32>
      tpu.vector_store %arg10[%c0_17, %c0_18], %21 {strides = array<i32>} : memref<16x32xf32, #tpu.memory_space<vmem>>, vector<16x32xf32>,
    } else {
    }
    %c0 = arith.constant 0 : index
    %c0_1 = arith.constant 0 : index
    %3 = vector.load %arg2[%c0, %c0_1] : memref<16x32xf32, #tpu.memory_space<vmem>>, vector<16x32xf32>
    %4 = arith.truncf %3 : vector<16x32xf32> to vector<16x32xbf16>
    %c0_2 = arith.constant 0 : index
    %c0_3 = arith.constant 0 : index
    %5 = vector.load %arg3[%c0_2, %c0_3] : memref<32x64xbf16, #tpu.memory_space<vmem>>, vector<32x64xbf16>
    %cst = arith.constant dense<0.000000e+00> : vector<16x64xf32>
    %6 = tpu.matmul %4, %5, %cst {dimension_numbers = #tpu.dot_dimension_numbers<[1], [0], [0], [1], [0, 0, 1, 1], [], []>} : vector<16x32xbf16>, vector<32x64xbf16>, vector<16x64xf32> -> vector<16x64xf32>
    %c0_4 = arith.constant 0 : index
    %c0_5 = arith.constant 0 : index
    %7 = vector.load %arg4[%c0_4, %c0_5] : memref<1x64xf32, #tpu.memory_space<vmem>>, vector<1x64xf32>
    %8 = vector.broadcast %7 : vector<1x64xf32> to vector<16x64xf32>
    %9 = arith.addf %6, %8 : vector<16x64xf32>
    %cst_6 = arith.constant 0.000000e+00 : f32
    %10 = vector.broadcast %cst_6 : f32 to vector<16x64xf32>
    %11 = arith.maximumf %9, %10 : vector<16x64xf32>
    %c0_7 = arith.constant 0 : index
    %c0_8 = arith.constant 0 : index
    %12 = vector.load %arg10[%c0_7, %c0_8] : memref<16x32xf32, #tpu.memory_space<vmem>>, vector<16x32xf32>
    %13 = arith.truncf %11 : vector<16x64xf32> to vector<16x64xbf16>
    %c0_9 = arith.constant 0 : index
    %c0_10 = arith.constant 0 : index
    %14 = vector.load %arg5[%c0_9, %c0_10] : memref<64x32xbf16, #tpu.memory_space<vmem>>, vector<64x32xbf16>
    %cst_11 = arith.constant dense<0.000000e+00> : vector<16x32xf32>
    %15 = tpu.matmul %13, %14, %cst_11 {dimension_numbers = #tpu.dot_dimension_numbers<[1], [0], [0], [1], [0, 0, 1, 1], [], []>} : vector<16x64xbf16>, vector<64x32xbf16>, vector<16x32xf32> -> vector<16x32xf32>
    %16 = arith.addf %12, %15 : vector<16x32xf32>
    %c0_12 = arith.constant 0 : index
    %c0_13 = arith.constant 0 : index
    %17 = vector.load %arg10[%c0_12, %c0_13] : memref<16x32xf32, #tpu.memory_space<vmem>>, vector<16x32xf32>
    tpu.vector_store %arg10[%c0_12, %c0_13], %16 {strides = array<i32>} : memref<16x32xf32, #tpu.memory_space<vmem>>, vector<16x32xf32>,
    %c0_i32_14 = arith.constant 0 : i32
    %18 = arith.cmpi eq, %arg1, %c0_i32_14 : i32
    %19 = arith.extui %18 : i1 to i32
    %c0_i32_15 = arith.constant 0 : i32
    %20 = arith.cmpi ne, %19, %c0_i32_15 : i32
    scf.if %20 {
      %c0_16 = arith.constant 0 : index
      %c0_17 = arith.constant 0 : index
      %21 = vector.load %arg10[%c0_16, %c0_17] : memref<16x32xf32, #tpu.memory_space<vmem>>, vector<16x32xf32>
      %c0_18 = arith.constant 0 : index
      %c0_19 = arith.constant 0 : index
      %22 = vector.load %arg6[%c0_18, %c0_19] : memref<1x32xf32, #tpu.memory_space<vmem>>, vector<1x32xf32>
      %23 = vector.broadcast %22 : vector<1x32xf32> to vector<16x32xf32>
      %24 = arith.addf %21, %23 : vector<16x32xf32>
      %c0_20 = arith.constant 0 : index
      %c0_21 = arith.constant 0 : index
      %25 = vector.load %arg2[%c0_20, %c0_21] : memref<16x32xf32, #tpu.memory_space<vmem>>, vector<16x32xf32>
      %26 = arith.addf %25, %24 : vector<16x32xf32>
      %c0_22 = arith.constant 0 : index
      %c0_23 = arith.constant 0 : index
      %27 = vector.load %arg7[%c0_22, %c0_23] : memref<1x32xf32, #tpu.memory_space<vmem>>, vector<1x32xf32>
      %c0_24 = arith.constant 0 : index
      %c0_25 = arith.constant 0 : index
      %28 = vector.load %arg8[%c0_24, %c0_25] : memref<1x32xf32, #tpu.memory_space<vmem>>, vector<1x32xf32>
      %cst_26 = arith.constant dense<0.000000e+00> : vector<16xf32>
      %29 = vector.multi_reduction <add>, %26, %cst_26 [1] : vector<16x32xf32> to vector<16xf32>
      %30 = vector.shape_cast %29 : vector<16xf32> to vector<16x1xf32>
      %cst_27 = arith.constant 3.200000e+01 : f32
      %31 = vector.broadcast %cst_27 : f32 to vector<16x1xf32>
      %32 = arith.divf %30, %31 : vector<16x1xf32>
      %33 = vector.broadcast %32 : vector<16x1xf32> to vector<16x32xf32>
      %34 = arith.subf %26, %33 : vector<16x32xf32>
      %35 = arith.mulf %34, %34 : vector<16x32xf32>
      %cst_28 = arith.constant dense<0.000000e+00> : vector<16xf32>
      %36 = vector.multi_reduction <add>, %35, %cst_28 [1] : vector<16x32xf32> to vector<16xf32>
      %37 = vector.shape_cast %36 : vector<16xf32> to vector<16x1xf32>
      %cst_29 = arith.constant 3.200000e+01 : f32
      %38 = vector.broadcast %cst_29 : f32 to vector<16x1xf32>
      %39 = arith.divf %37, %38 : vector<16x1xf32>
      %40 = vector.broadcast %32 : vector<16x1xf32> to vector<16x32xf32>
      %41 = arith.subf %26, %40 : vector<16x32xf32>
      %cst_30 = arith.constant 9.99999996E-13 : f32
      %42 = vector.broadcast %cst_30 : f32 to vector<16x1xf32>
      %43 = arith.addf %39, %42 : vector<16x1xf32>
      %44 = math.rsqrt %43 : vector<16x1xf32>
      %45 = vector.broadcast %44 : vector<16x1xf32> to vector<16x32xf32>
      %46 = arith.mulf %41, %45 : vector<16x32xf32>
      %47 = vector.broadcast %27 : vector<1x32xf32> to vector<16x32xf32>
      %48 = arith.mulf %47, %46 : vector<16x32xf32>
      %49 = vector.broadcast %28 : vector<1x32xf32> to vector<16x32xf32>
      %50 = arith.addf %48, %49 : vector<16x32xf32>
      %c0_31 = arith.constant 0 : index
      %c0_32 = arith.constant 0 : index
      %51 = vector.load %arg9[%c0_31, %c0_32] : memref<16x32xf32, #tpu.memory_space<vmem>>, vector<16x32xf32>
      tpu.vector_store %arg9[%c0_31, %c0_32], %50 {strides = array<i32>} : memref<16x32xf32, #tpu.memory_space<vmem>>, vector<16x32xf32>,
    } else {
    }
    return
  }
  func.func @transform_0(%arg0: i32, %arg1: i32) -> (i32, i32) {
    %c0_i32 = arith.constant 0 : i32
    %c0_i32_0 = arith.constant 0 : i32
    return %arg0, %c0_i32 : i32, i32
  }
  func.func @transform_1(%arg0: i32, %arg1: i32) -> (i32, i32) {
    %c0_i32 = arith.constant 0 : i32
    %c0_i32_0 = arith.constant 0 : i32
    return %c0_i32, %arg1 : i32, i32
  }
  func.func @transform_2(%arg0: i32, %arg1: i32) -> (i32, i32) {
    %c0_i32 = arith.constant 0 : i32
    %c0_i32_0 = arith.constant 0 : i32
    return %c0_i32, %arg1 : i32, i32
  }
  func.func @transform_3(%arg0: i32, %arg1: i32) -> (i32, i32) {
    %c0_i32 = arith.constant 0 : i32
    %c0_i32_0 = arith.constant 0 : i32
    return %arg1, %c0_i32 : i32, i32
  }
  func.func @transform_4(%arg0: i32, %arg1: i32) -> (i32, i32) {
    %c0_i32 = arith.constant 0 : i32
    %c0_i32_0 = arith.constant 0 : i32
    %c0_i32_1 = arith.constant 0 : i32
    return %c0_i32, %c0_i32_0 : i32, i32
  }
  func.func @transform_5(%arg0: i32, %arg1: i32) -> (i32, i32) {
    %c0_i32 = arith.constant 0 : i32
    %c0_i32_0 = arith.constant 0 : i32
    %c0_i32_1 = arith.constant 0 : i32
    return %c0_i32, %c0_i32_0 : i32, i32
  }
  func.func @transform_6(%arg0: i32, %arg1: i32) -> (i32, i32) {
    %c0_i32 = arith.constant 0 : i32
    %c0_i32_0 = arith.constant 0 : i32
    %c0_i32_1 = arith.constant 0 : i32
    return %c0_i32, %c0_i32_0 : i32, i32
  }
  func.func @transform_7(%arg0: i32, %arg1: i32) -> (i32, i32) {
    %c0_i32 = arith.constant 0 : i32
    %c0_i32_0 = arith.constant 0 : i32
    return %arg0, %c0_i32 : i32, i32
  }
}

module attributes {stable_mosaic.version = 11 : i64} {
  func.func @_ffn_ln_kernel(%arg0: i32, %arg1: i32, %arg2: memref<16x32xf32, #tpu.memory_space<vmem>>, %arg3: memref<32x64xbf16, #tpu.memory_space<vmem>>, %arg4: memref<1x64xf32, #tpu.memory_space<vmem>>, %arg5: memref<64x32xbf16, #tpu.memory_space<vmem>>, %arg6: memref<1x32xf32, #tpu.memory_space<vmem>>, %arg7: memref<1x32xf32, #tpu.memory_space<vmem>>, %arg8: memref<1x32xf32, #tpu.memory_space<vmem>>, %arg9: memref<16x32xf32, #tpu.memory_space<vmem>>, %arg10: memref<16x32xf32, #tpu.memory_space<vmem>>) attributes {dimension_semantics = [#tpu.dimension_semantics<parallel>, #tpu.dimension_semantics<arbitrary>], iteration_bounds = array<i64: 1, 1>, scalar_prefetch = 0 : i64, scratch_operands = 1 : i64, tpu.core_type = #tpu.core_type<tc>, window_params = [{transform_indices = @transform_0, window_bounds = array<i64: 16, 32>}, {transform_indices = @transform_1, window_bounds = array<i64: 32, 64>}, {transform_indices = @transform_2, window_bounds = array<i64: 1, 64>}, {transform_indices = @transform_3, window_bounds = array<i64: 64, 32>}, {pipeline_mode = #tpu.pipeline_mode<synchronous>, transform_indices = @transform_4, window_bounds = array<i64: 1, 32>}, {pipeline_mode = #tpu.pipeline_mode<synchronous>, transform_indices = @transform_5, window_bounds = array<i64: 1, 32>}, {pipeline_mode = #tpu.pipeline_mode<synchronous>, transform_indices = @transform_6, window_bounds = array<i64: 1, 32>}, {transform_indices = @transform_7, window_bounds = array<i64: 16, 32>}]} {
    %c0_i32 = arith.constant 0 : i32
    %0 = arith.cmpi eq, %arg1, %c0_i32 : i32
    %1 = arith.extui %0 : i1 to i32
    %c0_i32_0 = arith.constant 0 : i32
    %2 = arith.cmpi ne, %1, %c0_i32_0 : i32
    scf.if %2 {
      %cst_16 = arith.constant 0.000000e+00 : f32
      %21 = vector.broadcast %cst_16 : f32 to vector<16x32xf32>
      %c0_17 = arith.constant 0 : index
      %c0_18 = arith.constant 0 : index
      %22 = vector.load %arg10[%c0_17, %c0_18] : memref<16x32xf32, #tpu.memory_space<vmem>>, vector<16x32xf32>
      tpu.vector_store %arg10[%c0_17, %c0_18], %21 {strides = array<i32>} : memref<16x32xf32, #tpu.memory_space<vmem>>, vector<16x32xf32>,
    } else {
    }
    %c0 = arith.constant 0 : index
    %c0_1 = arith.constant 0 : index
    %3 = vector.load %arg2[%c0, %c0_1] : memref<16x32xf32, #tpu.memory_space<vmem>>, vector<16x32xf32>
    %4 = arith.truncf %3 : vector<16x32xf32> to vector<16x32xbf16>
    %c0_2 = arith.constant 0 : index
    %c0_3 = arith.constant 0 : index
    %5 = vector.load %arg3[%c0_2, %c0_3] : memref<32x64xbf16, #tpu.memory_space<vmem>>, vector<32x64xbf16>
    %cst = arith.constant dense<0.000000e+00> : vector<16x64xf32>
    %6 = tpu.matmul %4, %5, %cst {dimension_numbers = #tpu.dot_dimension_numbers<[1], [0], [0], [1], [0, 0, 1, 1], [], []>} : vector<16x32xbf16>, vector<32x64xbf16>, vector<16x64xf32> -> vector<16x64xf32>
    %c0_4 = arith.constant 0 : index
    %c0_5 = arith.constant 0 : index
    %7 = vector.load %arg4[%c0_4, %c0_5] : memref<1x64xf32, #tpu.memory_space<vmem>>, vector<1x64xf32>
    %8 = vector.broadcast %7 : vector<1x64xf32> to vector<16x64xf32>
    %9 = arith.addf %6, %8 : vector<16x64xf32>
    %cst_6 = arith.constant 0.000000e+00 : f32
    %10 = vector.broadcast %cst_6 : f32 to vector<16x64xf32>
    %11 = arith.maximumf %9, %10 : vector<16x64xf32>
    %c0_7 = arith.constant 0 : index
    %c0_8 = arith.constant 0 : index
    %12 = vector.load %arg10[%c0_7, %c0_8] : memref<16x32xf32, #tpu.memory_space<vmem>>, vector<16x32xf32>
    %13 = arith.truncf %11 : vector<16x64xf32> to vector<16x64xbf16>
    %c0_9 = arith.constant 0 : index
    %c0_10 = arith.constant 0 : index
    %14 = vector.load %arg5[%c0_9, %c0_10] : memref<64x32xbf16, #tpu.memory_space<vmem>>, vector<64x32xbf16>
    %cst_11 = arith.constant dense<0.000000e+00> : vector<16x32xf32>
    %15 = tpu.matmul %13, %14, %cst_11 {dimension_numbers = #tpu.dot_dimension_numbers<[1], [0], [0], [1], [0, 0, 1, 1], [], []>} : vector<16x64xbf16>, vector<64x32xbf16>, vector<16x32xf32> -> vector<16x32xf32>
    %16 = arith.addf %12, %15 : vector<16x32xf32>
    %c0_12 = arith.constant 0 : index
    %c0_13 = arith.constant 0 : index
    %17 = vector.load %arg10[%c0_12, %c0_13] : memref<16x32xf32, #tpu.memory_space<vmem>>, vector<16x32xf32>
    tpu.vector_store %arg10[%c0_12, %c0_13], %16 {strides = array<i32>} : memref<16x32xf32, #tpu.memory_space<vmem>>, vector<16x32xf32>,
    %c0_i32_14 = arith.constant 0 : i32
    %18 = arith.cmpi eq, %arg1, %c0_i32_14 : i32
    %19 = arith.extui %18 : i1 to i32
    %c0_i32_15 = arith.constant 0 : i32
    %20 = arith.cmpi ne, %19, %c0_i32_15 : i32
    scf.if %20 {
      %c0_16 = arith.constant 0 : index
      %c0_17 = arith.constant 0 : index
      %21 = vector.load %arg10[%c0_16, %c0_17] : memref<16x32xf32, #tpu.memory_space<vmem>>, vector<16x32xf32>
      %c0_18 = arith.constant 0 : index
      %c0_19 = arith.constant 0 : index
      %22 = vector.load %arg6[%c0_18, %c0_19] : memref<1x32xf32, #tpu.memory_space<vmem>>, vector<1x32xf32>
      %23 = vector.broadcast %22 : vector<1x32xf32> to vector<16x32xf32>
      %24 = arith.addf %21, %23 : vector<16x32xf32>
      %c0_20 = arith.constant 0 : index
      %c0_21 = arith.constant 0 : index
      %25 = vector.load %arg2[%c0_20, %c0_21] : memref<16x32xf32, #tpu.memory_space<vmem>>, vector<16x32xf32>
      %26 = arith.addf %25, %24 : vector<16x32xf32>
      %c0_22 = arith.constant 0 : index
      %c0_23 = arith.constant 0 : index
      %27 = vector.load %arg7[%c0_22, %c0_23] : memref<1x32xf32, #tpu.memory_space<vmem>>, vector<1x32xf32>
      %c0_24 = arith.constant 0 : index
      %c0_25 = arith.constant 0 : index
      %28 = vector.load %arg8[%c0_24, %c0_25] : memref<1x32xf32, #tpu.memory_space<vmem>>, vector<1x32xf32>
      %cst_26 = arith.constant dense<0.000000e+00> : vector<16xf32>
      %29 = vector.multi_reduction <add>, %26, %cst_26 [1] : vector<16x32xf32> to vector<16xf32>
      %30 = vector.shape_cast %29 : vector<16xf32> to vector<16x1xf32>
      %cst_27 = arith.constant 3.200000e+01 : f32
      %31 = vector.broadcast %cst_27 : f32 to vector<16x1xf32>
      %32 = arith.divf %30, %31 : vector<16x1xf32>
      %33 = vector.broadcast %32 : vector<16x1xf32> to vector<16x32xf32>
      %34 = arith.subf %26, %33 : vector<16x32xf32>
      %35 = arith.mulf %34, %34 : vector<16x32xf32>
      %cst_28 = arith.constant dense<0.000000e+00> : vector<16xf32>
      %36 = vector.multi_reduction <add>, %35, %cst_28 [1] : vector<16x32xf32> to vector<16xf32>
      %37 = vector.shape_cast %36 : vector<16xf32> to vector<16x1xf32>
      %cst_29 = arith.constant 3.200000e+01 : f32
      %38 = vector.broadcast %cst_29 : f32 to vector<16x1xf32>
      %39 = arith.divf %37, %38 : vector<16x1xf32>
      %40 = vector.broadcast %32 : vector<16x1xf32> to vector<16x32xf32>
      %41 = arith.subf %26, %40 : vector<16x32xf32>
      %cst_30 = arith.constant 9.99999996E-13 : f32
      %42 = vector.broadcast %cst_30 : f32 to vector<16x1xf32>
      %43 = arith.addf %39, %42 : vector<16x1xf32>
      %44 = math.rsqrt %43 : vector<16x1xf32>
      %45 = vector.broadcast %44 : vector<16x1xf32> to vector<16x32xf32>
      %46 = arith.mulf %41, %45 : vector<16x32xf32>
      %47 = vector.broadcast %27 : vector<1x32xf32> to vector<16x32xf32>
      %48 = arith.mulf %47, %46 : vector<16x32xf32>
      %49 = vector.broadcast %28 : vector<1x32xf32> to vector<16x32xf32>
      %50 = arith.addf %48, %49 : vector<16x32xf32>
      %c0_31 = arith.constant 0 : index
      %c0_32 = arith.constant 0 : index
      %51 = vector.load %arg9[%c0_31, %c0_32] : memref<16x32xf32, #tpu.memory_space<vmem>>, vector<16x32xf32>
      tpu.vector_store %arg9[%c0_31, %c0_32], %50 {strides = array<i32>} : memref<16x32xf32, #tpu.memory_space<vmem>>, vector<16x32xf32>,
    } else {
    }
    return
  }
  func.func @transform_0(%arg0: i32, %arg1: i32) -> (i32, i32) {
    %c0_i32 = arith.constant 0 : i32
    %c0_i32_0 = arith.constant 0 : i32
    return %arg0, %c0_i32 : i32, i32
  }
  func.func @transform_1(%arg0: i32, %arg1: i32) -> (i32, i32) {
    %c0_i32 = arith.constant 0 : i32
    %c0_i32_0 = arith.constant 0 : i32
    return %c0_i32, %arg1 : i32, i32
  }
  func.func @transform_2(%arg0: i32, %arg1: i32) -> (i32, i32) {
    %c0_i32 = arith.constant 0 : i32
    %c0_i32_0 = arith.constant 0 : i32
    return %c0_i32, %arg1 : i32, i32
  }
  func.func @transform_3(%arg0: i32, %arg1: i32) -> (i32, i32) {
    %c0_i32 = arith.constant 0 : i32
    %c0_i32_0 = arith.constant 0 : i32
    return %arg1, %c0_i32 : i32, i32
  }
  func.func @transform_4(%arg0: i32, %arg1: i32) -> (i32, i32) {
    %c0_i32 = arith.constant 0 : i32
    %c0_i32_0 = arith.constant 0 : i32
    %c0_i32_1 = arith.constant 0 : i32
    return %c0_i32, %c0_i32_0 : i32, i32
  }
  func.func @transform_5(%arg0: i32, %arg1: i32) -> (i32, i32) {
    %c0_i32 = arith.constant 0 : i32
    %c0_i32_0 = arith.constant 0 : i32
    %c0_i32_1 = arith.constant 0 : i32
    return %c0_i32, %c0_i32_0 : i32, i32
  }
  func.func @transform_6(%arg0: i32, %arg1: i32) -> (i32, i32) {
    %c0_i32 = arith.constant 0 : i32
    %c0_i32_0 = arith.constant 0 : i32
    %c0_i32_1 = arith.constant 0 : i32
    return %c0_i32, %c0_i32_0 : i32, i32
  }
  func.func @transform_7(%arg0: i32, %arg1: i32) -> (i32, i32) {
    %c0_i32 = arith.constant 0 : i32
    %c0_i32_0 = arith.constant 0 : i32
    return %arg0, %c0_i32 : i32, i32
  }
}

</mosaic_0001>

<bundles_post_ra>
// kernel: decoder_forward.11
= control target key start
LH: loop header
LB: loop body
LE: loop exit
PB: predicated region body
PF: predicated region fallthrough
CT: control target
= control target key end

     0   :  { %v352_v1 = vmov 0.0   ;;  %vm353_vm0 = vmmov 0   ;;  %vm32_vm1 = vcmask 261120   ;;  %s456_s0 = inlined_call_operand.vmem [shape: f32[16,32], index: 0, kind: input, shape index: {}]   ;;  %s457_s1 = inlined_call_operand.vmem [shape: bf16[32,64], index: 1, kind: input, shape index: {}]   ;;  %s458_s2 = inlined_call_operand.vmem [shape: f32[1,64], index: 2, kind: input, shape index: {}]   ;;  %s459_s3 = inlined_call_operand.vmem [shape: bf16[64,32], index: 3, kind: input, shape index: {}]   ;;  %s460_s4 = inlined_call_operand.vmem [shape: f32[1,32], index: 4, kind: input, shape index: {}]   ;;  %s461_s5 = inlined_call_operand.vmem [shape: f32[1,32], index: 5, kind: input, shape index: {}]   ;;  %s462_s6 = inlined_call_operand.vmem [shape: f32[1,32], index: 6, kind: input, shape index: {}]   ;;  %s463_s7 = inlined_call_operand.hbm [shape: f32[16,32], index: 7, kind: output, shape index: {}]  }
   0x1   :  { %v318_v0 = vld [vmem:[%s457_s1] sm:$0xff]   ;;  %293 = vmatprep.subr.bf16.mxu0 %v352_v1  ;;  %v319_v2 = vld [vmem:[%s457_s1 + $0x8] sm:$0xff]   ;;  %301 = vmatprep.subr.bf16.mxu1 %v352_v1  ;;  %33 = vst.msk [vmem:[#allocation2] sm:$0xff] %vm32_vm1, %v352_v1  ;;  %34 = vst.msk [vmem:[#allocation2 + $0x8] sm:$0xff] %vm32_vm1, %v352_v1 }
   0x2   :  { %294 = vmatpush3.bf16.msra.mxu0 %v318_v0  ;;  %297 = vmatprep.mubr.msk.bf16.mxu0 %vm353_vm0, %v352_v1  ;;  %v35_v3 = vld [vmem:[%s456_s0] sm:$0xff]  ;;  %v36_v4 = vld [vmem:[%s456_s0 + $0x8] sm:$0xff] }
   0x3   :  { %295 = vmatprep.subr.bf16.mxu0 %v352_v1  ;;  %v320_v5 = vld [vmem:[%s459_s3] sm:$0xff]   ;;  %309 = vmatprep.mubr.msk.bf16.mxu1 %vm353_vm0, %v352_v1  ;;  %v321_v6 = vld [vmem:[%s459_s3 + $0x8] sm:$0xff]   ;;  %v37_v7 = vpack.c.bf16 %v36_v4, %v35_v3 }
   0x4   :  { %302 = vmatpush3.bf16.msra.mxu1 %v320_v5 }
   0x5   :  { %303 = vmatprep.subr.bf16.mxu1 %v352_v1 }
   0x6   :  { %296 = vmatpush3.bf16.msra.mxu0 %v319_v2 }
   0x7   :  { %12 = vsyncpa [#allocation4], 0  ;;  %v322_v8 = vld [vmem:[%s459_s3 + $0x10] sm:$0xff]   ;;  %v323_v9 = vld [vmem:[%s459_s3 + $0x18] sm:$0xff]   ;;  %vm143_vm2 = vcmask 523264   ;;  %s354_s20 = smov [#allocation3]  }
   0x8   :  { %304 = vmatpush3.bf16.msra.mxu1 %v321_v6  ;;  %v273_v10 = vld [vmem:[%s458_s2] ss:$0 sm:$0xff]  ;;  %v109_v22 = vld [vmem:[#allocation2 + $0x8] sm:$0xff]  ;;  %s262_s21 = sshll.u32 %s354_s20, 4  ;;  %s263_s21 = int_to_ptr.vmem [resolvable:$true] %s262_s21 }
   0x9   :  { %298 = vmatmul.mubr.msk.bf16.vlgmr.msra.gmra.mrb[0].mxu0 %vm32_vm1, %v37_v7  ;;  %305 = vmatprep.subr.bf16.mxu1 %v352_v1  ;;  %v108_v20 = vld [vmem:[#allocation2] sm:$0xff]  ;;  %s328_s22 = scalar_lea.vmem %s263_s21, 256  ;;  %p333_p1 = scmp.lt.s32.totalorder %s263_s21, %s263_s21 }
   0xa   :  { %v282_v28 = vld [vmem:[%s460_s4] ss:$0 sm:$0xff]  ;;  %p329_p0 = scmp.ne.s32.totalorder %s263_s21, %s328_s22  ;;  %p334_p2 = scmp.lt.s32.totalorder %s328_s22, %s328_s22 }
   0xb   :  { %v283_v54 = vld [vmem:[%s461_s5] ss:$0 sm:$0xff] }
   0xc   :  { %306 = vmatpush3.bf16.msra.mxu1 %v322_v8  ;;  %v284_v56 = vld [vmem:[%s462_s6] ss:$0 sm:$0xff]  ;;  %p335_p3 = por %p334_p2, %p333_p1 }
   0xd   :  { %307 = vmatprep.subr.bf16.mxu1 %v352_v1 }
   0xe   :  { %p336_p4 = pnand %p335_p3, %p329_p0 }
  0x10   :  { %308 = vmatpush3.bf16.msra.mxu1 %v323_v9 }
  0xdc   :  { %v99_v11 = vpop.f32.mrb[0].mxu0 }
  0xdd   :  { %v100_v12 = vadd.f32 %v273_v10, %v99_v11  ;;  %v299_v13 = vpop.f32.mrb[1].mxu0 }
  0xde   :  { %v102_v14 = vpop.f32.mrb[2].mxu0 }
  0xdf   :  { %v103_v15 = vadd.f32 %v273_v10, %v102_v14  ;;  %v300_v16 = vpop.f32.mrb[3].mxu0  ;;  %v106_v17 = vmax.f32 %v100_v12, 0.0 }
  0xe1   :  { %v107_v18 = vmax.f32 %v103_v15, 0.0 }
  0xe3   :  { %v110_v19 = vpack.c.bf16 %v107_v18, %v106_v17 }
  0xe5   :  { %310 = vmatmul.mubr.msk.bf16.vlgmr.msra.gmra.mrb[0].mxu1 %vm143_vm2, %v110_v19 }
 0x1b8   :  { %v181_v21 = vpop.f32.mrb[0].mxu1 }
 0x1b9   :  { %v188_v23 = vadd.f32 %v181_v21, %v108_v20  ;;  %v311_v24 = vpop.f32.mrb[1].mxu1 }
 0x1ba   :  { %v184_v25 = vpop.f32.mrb[2].mxu1 }
 0x1bb   :  { %190 = vst.msk [vmem:[#allocation2] sm:$0xff] %vm32_vm1, %v188_v23  ;;  %v189_v26 = vadd.f32 %v184_v25, %v109_v22  ;;  %v312_v27 = vpop.f32.mrb[3].mxu1 }
 0x1bd   :  { %191 = vst.msk [vmem:[#allocation2 + $0x8] sm:$0xff] %vm32_vm1, %v189_v26 }
 0x1c2   :  { %v195_v29 = vld [vmem:[#allocation2] sm:$0xff] }
 0x1c3   :  { %v204_v30 = vadd.f32 %v282_v28, %v195_v29 }
 0x1c4   :  { %v196_v31 = vld [vmem:[#allocation2 + $0x8] sm:$0xff] }
 0x1c5   :  { %v208_v32 = vadd.f32 %v204_v30, %v35_v3  ;;  %v205_v33 = vadd.f32 %v282_v28, %v196_v31 }
 0x1c7   :  { %v212_v34 = vsel %vm32_vm1, %v208_v32, 0.0  ;;  %v209_v35 = vadd.f32 %v205_v33, %v36_v4 }
 0x1c8   :  { %213 = vadd.xlane.f32.xlu0 %v212_v34 }
 0x1c9   :  { %v215_v36 = vsel %vm32_vm1, %v209_v35, 0.0 }
 0x1cc   :  { %216 = vadd.xlane.f32.xlu0 %v215_v36 }
 0x255   :  { %v214_v37 = vpop.xlane.xlu0 %213 }
 0x256   :  { %v219_v38 = vmul.f32 0.03125, %v214_v37 }
 0x258   :  { %v221_v39 = vsub.f32 %v208_v32, %v219_v38 }
 0x259   :  { %v217_v40 = vpop.xlane.xlu0 %216 }
 0x25a   :  { %v220_v41 = vmul.f32 0.03125, %v217_v40  ;;  %v223_v42 = vmul.f32 %v221_v39, %v221_v39 }
 0x25c   :  { %v222_v43 = vsub.f32 %v209_v35, %v220_v41  ;;  %v225_v44 = vsel %vm32_vm1, %v223_v42, 0.0 }
 0x25d   :  { %226 = vadd.xlane.f32.xlu1 %v225_v44 }
 0x25e   :  { %v224_v45 = vmul.f32 %v222_v43, %v222_v43 }
 0x260   :  { %v228_v46 = vsel %vm32_vm1, %v224_v45, 0.0 }
 0x261   :  { %229 = vadd.xlane.f32.xlu1 %v228_v46 }
 0x2ea   :  { %v227_v47 = vpop.xlane.xlu1 %226 }
 0x2eb   :  { %v231_v48 = vmul.f32 0.03125, %v227_v47 }
 0x2ed   :  { %v233_v49 = vadd.f32 1e-12, %v231_v48 }
 0x2ee   :  { %v230_v50 = vpop.xlane.xlu1 %229 }
 0x2ef   :  { %324 = vrsqrt.f32 %v233_v49  ;;  %v232_v51 = vmul.f32 0.03125, %v230_v50 }
 0x2f1   :  { %v234_v52 = vadd.f32 1e-12, %v232_v51 }
 0x2f3   :  { %326 = vrsqrt.f32 %v234_v52 }
 0x2f9   :  { %v325_v53 = vpop.eup %324 }
 0x2fa   :  { %v237_v55 = vmul.f32 %v325_v53, %v221_v39 }
 0x2fc   :  { %v245_v57 = vmul.f32 %v283_v54, %v237_v55 }
 0x2fd   :  { %v327_v58 = vpop.eup %326 }
 0x2fe   :  { %v238_v59 = vmul.f32 %v327_v58, %v222_v43  ;;  %v253_v60 = vadd.f32 %v284_v56, %v245_v57 }
 0x300   :  { %v246_v61 = vmul.f32 %v283_v54, %v238_v59  ;;  %255 = vst.msk [vmem:[#allocation3] sm:$0xff] %vm32_vm1, %v253_v60 }
 0x302   :  { %v254_v62 = vadd.f32 %v284_v56, %v246_v61 }
 0x304   :  { %256 = vst.msk [vmem:[#allocation3 + $0x8] sm:$0xff] %vm32_vm1, %v254_v62 }
 0x305   :  { %339 = shalt.err (!%p336_p4)
}
 0x306   :  { %s340_s23 = scalar_lea.hbm %s463_s7, 256 }
 0x307   :  { %p341_p5 = scmp.ne.s32.totalorder %s463_s7, %s340_s23  ;;  %p344_p6 = scmp.lt.u32.totalorder %s340_s23, %s463_s7 }
 0x309   :  { %p346_p7 = pnand %p344_p6, %p341_p5 }
 0x30b   :  { %349 = shalt.err (!%p346_p7)
}
 0x30c   :  { %s355_s28 = smov 128   ;;  %s356_s29 = smov 8  }
 0x30d   :  { %268 = dma.vmem_to_hbm [thread:$0]  %s263_s21, 256, %s463_s7, [#allocation4], %s355_s28, %s355_s28, %s356_s29  }
 0x30e   :  { %350 = dma.done.wait [#allocation4], 256  }
 0x30f   :  { %351 = vsyncadd [#allocation4], 4294967040 }
 0x310   :  { %272 = vsyncpa [#allocation4], 1 }

// kernel: decoder_forward.8
= control target key start
LH: loop header
LB: loop body
LE: loop exit
PB: predicated region body
PF: predicated region fallthrough
CT: control target
= control target key end

     0   :  { %vm31_vm0 = vcmask 261120   ;;  %v312_v0 = vmov 0.0   ;;  %vm313_vm1 = vmmov 0   ;;  %vm142_vm2 = vcmask 523264   ;;  %s407_s1 = inlined_call_operand.vmem [shape: bf16[32,64], index: 1, kind: input, shape index: {}]   ;;  %s408_s0 = inlined_call_operand.vmem [shape: f32[16,32], index: 0, kind: input, shape index: {}]   ;;  %s409_s3 = inlined_call_operand.vmem [shape: bf16[64,32], index: 3, kind: input, shape index: {}]   ;;  %s410_s2 = inlined_call_operand.vmem [shape: f32[1,64], index: 2, kind: input, shape index: {}]   ;;  %s411_s4 = inlined_call_operand.vmem [shape: f32[1,32], index: 4, kind: input, shape index: {}]   ;;  %s412_s5 = inlined_call_operand.vmem [shape: f32[1,32], index: 5, kind: input, shape index: {}]   ;;  %s413_s6 = inlined_call_operand.vmem [shape: f32[1,32], index: 6, kind: input, shape index: {}]   ;;  %s414_s7 = inlined_call_operand.vmem [shape: f32[16,32], index: 7, kind: output, shape index: {}]  }
   0x1   :  { %280 = vmatprep.subr.bf16.mxu0 %v312_v0  ;;  %v302_v1 = vld [vmem:[%s407_s1] sm:$0xff]   ;;  %284 = vmatprep.mubr.msk.bf16.mxu0 %vm313_vm1, %v312_v0  ;;  %32 = vst.msk [vmem:[#allocation2] sm:$0xff] %vm31_vm0, %v312_v0  ;;  %33 = vst.msk [vmem:[#allocation2 + $0x8] sm:$0xff] %vm31_vm0, %v312_v0  ;;  %v303_v2 = vld [vmem:[%s407_s1 + $0x8] sm:$0xff]  }
   0x2   :  { %288 = vmatprep.subr.bf16.mxu1 %v312_v0  ;;  %296 = vmatprep.mubr.msk.bf16.mxu1 %vm313_vm1, %v312_v0  ;;  %v34_v3 = vld [vmem:[%s408_s0] sm:$0xff]  ;;  %v35_v4 = vld [vmem:[%s408_s0 + $0x8] sm:$0xff]  ;;  %v306_v8 = vld [vmem:[%s409_s3 + $0x10] sm:$0xff]  }
   0x3   :  { %281 = vmatpush3.bf16.msra.mxu0 %v302_v1  ;;  %v304_v5 = vld [vmem:[%s409_s3] sm:$0xff]   ;;  %v305_v6 = vld [vmem:[%s409_s3 + $0x8] sm:$0xff]   ;;  %v36_v7 = vpack.c.bf16 %v35_v4, %v34_v3  ;;  %v307_v9 = vld [vmem:[%s409_s3 + $0x18] sm:$0xff]  }
   0x4   :  { %282 = vmatprep.subr.bf16.mxu0 %v312_v0  ;;  %289 = vmatpush3.bf16.msra.mxu1 %v304_v5  ;;  %v260_v10 = vld [vmem:[%s410_s2] ss:$0 sm:$0xff] }
   0x5   :  { %290 = vmatprep.subr.bf16.mxu1 %v312_v0  ;;  %v269_v28 = vld [vmem:[%s411_s4] ss:$0 sm:$0xff] }
   0x6   :  { %v270_v54 = vld [vmem:[%s412_s5] ss:$0 sm:$0xff] }
   0x7   :  { %283 = vmatpush3.bf16.msra.mxu0 %v303_v2  ;;  %v271_v56 = vld [vmem:[%s413_s6] ss:$0 sm:$0xff] }
   0x8   :  { %291 = vmatpush3.bf16.msra.mxu1 %v305_v6  ;;  %v107_v20 = vld [vmem:[#allocation2] sm:$0xff]  ;;  %v108_v22 = vld [vmem:[#allocation2 + $0x8] sm:$0xff] }
   0x9   :  { %292 = vmatprep.subr.bf16.mxu1 %v312_v0 }
   0xa   :  { %285 = vmatmul.mubr.msk.bf16.vlgmr.msra.gmra.mrb[0].mxu0 %vm31_vm0, %v36_v7 }
   0xc   :  { %293 = vmatpush3.bf16.msra.mxu1 %v306_v8 }
   0xd   :  { %294 = vmatprep.subr.bf16.mxu1 %v312_v0 }
  0x10   :  { %295 = vmatpush3.bf16.msra.mxu1 %v307_v9 }
  0xdd   :  { %v98_v11 = vpop.f32.mrb[0].mxu0 }
  0xde   :  { %v99_v12 = vadd.f32 %v260_v10, %v98_v11  ;;  %v286_v13 = vpop.f32.mrb[1].mxu0 }
  0xdf   :  { %v101_v14 = vpop.f32.mrb[2].mxu0 }
  0xe0   :  { %v102_v15 = vadd.f32 %v260_v10, %v101_v14  ;;  %v287_v16 = vpop.f32.mrb[3].mxu0  ;;  %v105_v17 = vmax.f32 %v99_v12, 0.0 }
  0xe2   :  { %v106_v18 = vmax.f32 %v102_v15, 0.0 }
  0xe4   :  { %v109_v19 = vpack.c.bf16 %v106_v18, %v105_v17 }
  0xe6   :  { %297 = vmatmul.mubr.msk.bf16.vlgmr.msra.gmra.mrb[0].mxu1 %vm142_vm2, %v109_v19 }
 0x1b9   :  { %v180_v21 = vpop.f32.mrb[0].mxu1 }
 0x1ba   :  { %v187_v23 = vadd.f32 %v180_v21, %v107_v20  ;;  %v298_v24 = vpop.f32.mrb[1].mxu1 }
 0x1bb   :  { %v183_v25 = vpop.f32.mrb[2].mxu1 }
 0x1bc   :  { %189 = vst.msk [vmem:[#allocation2] sm:$0xff] %vm31_vm0, %v187_v23  ;;  %v188_v26 = vadd.f32 %v183_v25, %v108_v22  ;;  %v299_v27 = vpop.f32.mrb[3].mxu1 }
 0x1be   :  { %190 = vst.msk [vmem:[#allocation2 + $0x8] sm:$0xff] %vm31_vm0, %v188_v26 }
 0x1c3   :  { %v194_v29 = vld [vmem:[#allocation2] sm:$0xff] }
 0x1c4   :  { %v203_v30 = vadd.f32 %v269_v28, %v194_v29 }
 0x1c5   :  { %v195_v31 = vld [vmem:[#allocation2 + $0x8] sm:$0xff] }
 0x1c6   :  { %v207_v32 = vadd.f32 %v203_v30, %v34_v3  ;;  %v204_v33 = vadd.f32 %v269_v28, %v195_v31 }
 0x1c8   :  { %v211_v34 = vsel %vm31_vm0, %v207_v32, 0.0  ;;  %v208_v35 = vadd.f32 %v204_v33, %v35_v4 }
 0x1c9   :  { %212 = vadd.xlane.f32.xlu0 %v211_v34 }
 0x1ca   :  { %v214_v36 = vsel %vm31_vm0, %v208_v35, 0.0 }
 0x1cd   :  { %215 = vadd.xlane.f32.xlu0 %v214_v36 }
 0x256   :  { %v213_v37 = vpop.xlane.xlu0 %212 }
 0x257   :  { %v218_v38 = vmul.f32 0.03125, %v213_v37 }
 0x259   :  { %v220_v39 = vsub.f32 %v207_v32, %v218_v38 }
 0x25a   :  { %v216_v40 = vpop.xlane.xlu0 %215 }
 0x25b   :  { %v219_v41 = vmul.f32 0.03125, %v216_v40  ;;  %v222_v42 = vmul.f32 %v220_v39, %v220_v39 }
 0x25d   :  { %v221_v43 = vsub.f32 %v208_v35, %v219_v41  ;;  %v224_v44 = vsel %vm31_vm0, %v222_v42, 0.0 }
 0x25e   :  { %225 = vadd.xlane.f32.xlu1 %v224_v44 }
 0x25f   :  { %v223_v45 = vmul.f32 %v221_v43, %v221_v43 }
 0x261   :  { %v227_v46 = vsel %vm31_vm0, %v223_v45, 0.0 }
 0x262   :  { %228 = vadd.xlane.f32.xlu1 %v227_v46 }
 0x2eb   :  { %v226_v47 = vpop.xlane.xlu1 %225 }
 0x2ec   :  { %v230_v48 = vmul.f32 0.03125, %v226_v47 }
 0x2ee   :  { %v232_v49 = vadd.f32 1e-12, %v230_v48 }
 0x2ef   :  { %v229_v50 = vpop.xlane.xlu1 %228 }
 0x2f0   :  { %308 = vrsqrt.f32 %v232_v49  ;;  %v231_v51 = vmul.f32 0.03125, %v229_v50 }
 0x2f2   :  { %v233_v52 = vadd.f32 1e-12, %v231_v51 }
 0x2f4   :  { %310 = vrsqrt.f32 %v233_v52 }
 0x2fa   :  { %v309_v53 = vpop.eup %308 }
 0x2fb   :  { %v236_v55 = vmul.f32 %v309_v53, %v220_v39 }
 0x2fd   :  { %v244_v57 = vmul.f32 %v270_v54, %v236_v55 }
 0x2fe   :  { %v311_v58 = vpop.eup %310 }
 0x2ff   :  { %v252_v59 = vadd.f32 %v271_v56, %v244_v57  ;;  %v237_v60 = vmul.f32 %v311_v58, %v221_v43 }
 0x301   :  { %254 = vst.msk [vmem:[%s414_s7] sm:$0xff] %vm31_vm0, %v252_v59  ;;  %v245_v61 = vmul.f32 %v270_v54, %v237_v60 }
 0x303   :  { %v253_v62 = vadd.f32 %v271_v56, %v245_v61 }
 0x305   :  { %255 = vst.msk [vmem:[%s414_s7 + $0x8] sm:$0xff] %vm31_vm0, %v253_v62 }

// kernel: decoder_forward.6
= control target key start
LH: loop header
LB: loop body
LE: loop exit
PB: predicated region body
PF: predicated region fallthrough
CT: control target
= control target key end

     0   :  { %s1817_s25 = smov 0   ;;  %s1819_s26 = smov 0   ;;  %s2037_s0 = inlined_call_operand.vmem [shape: f32[2,8,32], index: 0, kind: input, shape index: {}, may-alias: {0,1}]   ;;  %s2038_s1 = inlined_call_operand.vmem [shape: f32[2,8,32], index: 1, kind: input, shape index: {}, may-alias: {0,1}]   ;;  %s2039_s2 = inlined_call_operand.vmem [shape: bf16[2,8,8], index: 2, kind: input, shape index: {}]   ;;  %s2040_s3 = inlined_call_operand.vmem [shape: bf16[32,32], index: 3, kind: input, shape index: {}]   ;;  %s2041_s4 = inlined_call_operand.vmem [shape: f32[1,32], index: 4, kind: input, shape index: {}]   ;;  %s2042_s5 = inlined_call_operand.vmem [shape: bf16[32,32], index: 5, kind: input, shape index: {}]   ;;  %s2043_s6 = inlined_call_operand.vmem [shape: f32[1,32], index: 6, kind: input, shape index: {}]   ;;  %s2044_s7 = inlined_call_operand.vmem [shape: bf16[32,32], index: 7, kind: input, shape index: {}]   ;;  %s2045_s8 = inlined_call_operand.vmem [shape: f32[1,32], index: 8, kind: input, shape index: {}]   ;;  %s2046_s9 = inlined_call_operand.vmem [shape: bf16[4,8,32], index: 9, kind: input, shape index: {}]   ;;  %s2047_s10 = inlined_call_operand.vmem [shape: f32[1,32], index: 10, kind: input, shape index: {}]   ;;  %s2048_s11 = inlined_call_operand.vmem [shape: f32[1,32], index: 11, kind: input, shape index: {}]   ;;  %s2049_s12 = inlined_call_operand.vmem [shape: f32[1,32], index: 12, kind: input, shape index: {}]   ;;  %s2050_s13 = inlined_call_operand.vmem [shape: f32[2,8,32], index: 13, kind: output, shape index: {}]  }
   0x1   :  { %s1821_s27 = smov 0  }
   0x2 LB: > { %s35_s28 = sadd.s32 1, %s1736_s26  ;;  %p1499_p0 = scmp.ge.s32.totalorder %s1740_s27, 1  ;;  %s1740_s27 = sphi %s1821_s27, %s23_s27   ;;  %s1736_s26 = sphi %s1819_s26, %s2052_s26   ;;  %s1732_s25 = sphi %s1817_s25, %s2051_s25  }
   0x3   : > { %p37_p1 = scmp.ge.s32.totalorder %s35_s28, 2  ;;  %p428_p2 = scmp.lt.s32.totalorder %s1740_s27, 3 }
   0x5   : > { %s2054_s28 = smov (%p37_p1, %s35_s28), 0  ;;  %p429_p3 = pnand %p1499_p0, %p428_p2 }
   0x6   : > { %v1694_v0 = vld [vmem:[%s2042_s5] sm:$0xff] (!%p429_p3)   ;;  %v1742_v1 = vmov (!%p429_p3), 0.0   ;;  %v1695_v2 = vld [vmem:[%s2042_s5 + $0x8] sm:$0xff] (!%p429_p3)   ;;  %vm1743_vm0 = vmmov (!%p429_p3), 0   ;;  %p487_p4 = scmp.lt.s32.totalorder (!%p429_p3), %s1732_s25, 1  ;;  %vm542_vm1 = vcmask (!%p429_p3), 261120  }
   0x7   : > { %432 = sbr.rel (%p429_p3) target bundleno = 2925 (0xb6d), region = 72  ;;  %1577 = vmatprep.subr.bf16.mxu1 (!%p429_p3), %v1742_v1  ;;  %1569 = vmatprep.subr.bf16.mxu0 (!%p429_p3), %v1742_v1  ;;  %v1696_v3 = vld [vmem:[%s2040_s3] sm:$0xff] (!%p429_p3)   ;;  %v1697_v4 = vld [vmem:[%s2040_s3 + $0x8] sm:$0xff] (!%p429_p3)   ;;  %vm718_vm2 = vcmask (!%p429_p3), 64512   ;;  %s1744_s18 = smov (!%p429_p3), 120   ;;  %vm780_vm3 = vcmask (!%p429_p3), 1043456  }
   0x8   : > { %1578 = vmatpush3.bf16.msra.mxu1 (!%p429_p3), %v1694_v0  ;;  %1581 = vmatprep.mubr.msk.bf16.mxu1 (!%p429_p3), %vm1743_vm0, %v1742_v1  ;;  %v1508_v9 = vld [vmem:[%s2043_s6] ss:$0 sm:$0xff] (!%p429_p3)  ;;  %v1699_v25 = vld [vmem:[%s2044_s7 + $0x8] sm:$0xff] (!%p429_p3)   ;;  %s1745_s16 = smov (!%p429_p3), 112   ;;  %s1746_s22 = smov (!%p429_p3), 104  }
   0x9   : > { %1579 = vmatprep.subr.bf16.mxu1 (!%p429_p3), %v1742_v1  ;;  %1573 = vmatprep.mubr.msk.bf16.mxu0 (!%p429_p3), %vm1743_vm0, %v1742_v1  ;;  %v1504_v10 = vld [vmem:[%s2041_s4] ss:$0 sm:$0xff] (!%p429_p3) }
   0xa   : > { %1570 = vmatpush3.bf16.msra.mxu0 (!%p429_p3), %v1696_v3  ;;  %v1698_v24 = vld [vmem:[%s2044_s7] sm:$0xff] (!%p429_p3)  }
   0xb   : > { %1571 = vmatprep.subr.bf16.mxu0 (!%p429_p3), %v1742_v1  ;;  %v1512_v52 = vld [vmem:[%s2045_s8] ss:$0 sm:$0xff] (!%p429_p3) }
   0xc   : > { %1580 = vmatpush3.bf16.msra.mxu1 (!%p429_p3), %v1695_v2  ;;  %v1520_v2 = vld [vmem:[%s2046_s9 + $0x4] sm:$0xf] (!%p429_p3) }
   0xd   : > { %1593 = vmatprep.subr.bf16.mxu1 (!%p429_p3), %v1742_v1  ;;  %v946_v3 = vsel (!%p429_p3), %vm780_vm3, %v1520_v2, 0 }
   0xe   : > { %s2056_s25 = smov (!%p487_p4, %s1732_s25), 1  ;;  %1572 = vmatpush3.bf16.msra.mxu0 %v1697_v4 }
   0xf   : > { %s1858_s20 = sshll.u32 %s2056_s25, 3  ;;  %1585 = vmatprep.subr.bf16.mxu0 %v1742_v1  ;;  %s1502_s24 = sshll.u32 %s2056_s25, 2 }
  0x10   : > { %s497_s23 = scalar_lea.vmem %s2038_s1, %s1858_s20  ;;  %s493_s30 = scalar_lea.vmem %s2037_s0, %s1858_s20 }
  0x11   : > { %v517_v5 = vld [vmem:[%s497_s23] sm:$0xff]  ;;  %s504_s14 = scalar_lea.vmem %s2039_s2, %s1502_s24 }
  0x12   : > { %v518_v6 = vpack.c.bf16 %v517_v5, %v517_v5  ;;  %v1869_v7 = vld [vmem:[%s493_s30] sm:$0xff] }
  0x13   : > { %v516_v8 = vpack.c.bf16 %v1869_v7, %v1869_v7  ;;  %v514_v29 = vld [vmem:[%s504_s14] sm:$0xf] }
  0x14   : > { %1582 = vmatmul.mubr.msk.bf16.vlgmr.msra.gmra.mrb[0].mxu1 %vm542_vm1, %v518_v6  ;;  %v1921_v30 = vunpack.c.l.bf16 %v514_v29 }
  0x15   : > { %1574 = vmatmul.mubr.msk.bf16.vlgmr.msra.gmra.mrb[0].mxu0 %vm542_vm1, %v516_v8  ;;  %1595 = vmatprep.mubr.msk.bf16.mxu1 %vm1743_vm0, %v1742_v1 }
  0x16   : > { %1589 = vmatprep.mubr.msk.bf16.mxu0 %vm1743_vm0, %v1742_v1  ;;  %1586 = vmatpush3.bf16.msra.mxu0 %v1698_v24 }
  0x17   : > { %1587 = vmatprep.subr.bf16.mxu0 %v1742_v1 }
  0x1a   : > { %1588 = vmatpush3.bf16.msra.mxu0 %v1699_v25 }
  0x1b   : > { %1599 = vmatprep.subr.bf16.mxu0 %v1742_v1 }
  0x1d   : > { %1590 = vmatmul.mubr.msk.bf16.vlgmr.msra.gmra.mrb[4].mxu0 %vm542_vm1, %v518_v6 }
  0x1e   : > { %1601 = vmatprep.mubr.msk.bf16.mxu0 %vm1743_vm0, %v1742_v1 }
  0xe7   : > { %v646_v11 = vpop.f32.mrb[0].mxu1 }
  0xe8   : > { %v647_v12 = vadd.f32 %v1508_v9, %v646_v11  ;;  %v1583_v13 = vpop.f32.mrb[1].mxu1  ;;  %v580_v14 = vpop.f32.mrb[0].mxu0  ;;  %v825_v9 = vld [vmem:[%s2046_s9] sm:$0xf] }
  0xe9   : > { %v649_v15 = vpop.f32.mrb[2].mxu1  ;;  %v581_v16 = vadd.f32 %v1504_v10, %v580_v14  ;;  %v1575_v17 = vpop.f32.mrb[1].mxu0 }
  0xea   : > { %v1886_v18 = vpack.c.bf16 %v647_v12, %v647_v12  ;;  %v1584_v19 = vpop.f32.mrb[3].mxu1  ;;  %v583_v20 = vpop.f32.mrb[2].mxu0  ;;  %v992_v12 = vsel %vm780_vm3, %v825_v9, 0 }
  0xeb   : > { %v1576_v21 = vpop.f32.mrb[3].mxu0  ;;  %v1890_v22 = vpack.c.bf16 %v581_v16, %v581_v16 }
  0xec   : > { %830 = vrot.lane.b32.xlu0 %v1886_v18, %s1744_s18  ;;  %v723_v23 = vsel %vm718_vm2, %v1886_v18, 0 }
  0xed   : > { %1594 = vmatpush3.bf16.xpose.msra.mxu1 %v723_v23 }
  0xee   : > { %1605 = vmatprep.subr.bf16.mxu1 %v1742_v1 }
  0xf0   : > { %827 = vrot.lane.b32.xlu0 %v1890_v22, %s1744_s18  ;;  %v709_v46 = vpop.f32.mrb[4].mxu0 }
  0xf1   : > { %v1591_v47 = vpop.f32.mrb[5].mxu0  ;;  %v710_v53 = vadd.f32 %v1512_v52, %v709_v46 }
  0xf2   : > { %v712_v48 = vpop.f32.mrb[6].mxu0 }
  0xf3   : > { %v1592_v49 = vpop.f32.mrb[7].mxu0  ;;  %v1931_v54 = vpack.c.bf16 %v710_v53, %v710_v53 }
  0xf4   : > { %1596 = vmatmul.mubr.msk.bf16.vlgmr.msra.gmra.mrb[4].mxu1 %vm718_vm2, %v1890_v22 }
  0xf5   : > { %1607 = vmatprep.mubr.msk.bf16.mxu1 %vm1743_vm0, %v1742_v1  ;;  %v782_v55 = vsel %vm780_vm3, %v1931_v54, 0 }
  0xf6   : > { %1600 = vmatpush3.bf16.msra.mxu0 %v782_v55 }
  0xf7   : > { %1611 = vmatprep.subr.bf16.mxu0 %v1742_v1 }
 0x15e   : > { %v831_v26 = vpop.permute.xlu0 %830 }
 0x15f   : > { %v836_v27 = vsel %vm718_vm2, %v831_v26, 0 }
 0x160   : > { %1606 = vmatpush3.bf16.xpose.msra.mxu1 %v836_v27 }
 0x161   : > { %1617 = vmatprep.subr.bf16.mxu1 %v1742_v1 }
 0x162   : > { %v828_v28 = vpop.permute.xlu0 %827 }
 0x167   : > { %1608 = vmatmul.mubr.msk.bf16.vlgmr.msra.gmra.mrb[8].mxu1 %vm718_vm2, %v828_v28 }
 0x168   : > { %1619 = vmatprep.mubr.msk.bf16.mxu1 %vm1743_vm0, %v1742_v1  ;;  %1618 = vmatpush3.bf16.msra.mxu1 %v946_v3 }
 0x169   : > { %1629 = vmatprep.subr.bf16.mxu1 %v1742_v1 }
 0x1c7   : > { %v759_v31 = vpop.f32.mrb[4].mxu1 }
 0x1c8   : > { %v760_v32 = vadd.f32 %v759_v31, %v1921_v30  ;;  %v1597_v33 = vpop.f32.mrb[5].mxu1 }
 0x1c9   : > { %v762_v34 = vpop.f32.mrb[6].mxu1 }
 0x1ca   : > { %v1598_v35 = vpop.f32.mrb[7].mxu1  ;;  %v765_v36 = vsel %vm718_vm2, %v760_v32, -inf }
 0x1cb   : > { %766 = vmax.xlane.f32.xlu1 %v765_v36 }
 0x23a   : > { %v872_v37 = vpop.f32.mrb[8].mxu1 }
 0x23b   : > { %v873_v38 = vadd.f32 %v872_v37, %v1921_v30  ;;  %v1609_v39 = vpop.f32.mrb[9].mxu1 }
 0x23c   : > { %v875_v40 = vpop.f32.mrb[10].mxu1 }
 0x23d   : > { %v1610_v41 = vpop.f32.mrb[11].mxu1  ;;  %v878_v42 = vsel %vm718_vm2, %v873_v38, -inf }
 0x23e   : > { %879 = vmax.xlane.f32.xlu1 %v878_v42 }
 0x258   : > { %v767_v43 = vpop.xlane.xlu1 %766 }
 0x259   : > { %v768_v44 = vsub.f32 %v760_v32, %v767_v43 }
 0x25b   : > { %v769_v45 = vmul.f32 1.442695, %v768_v44 }
 0x25d   : > { %1700 = vpow2.f32 %v769_v45 }
 0x267   : > { %v1701_v50 = vpop.eup %1700 }
 0x268   : > { %v771_v51 = vsel %vm718_vm2, %v1701_v50, 0.0 }
 0x269   : > { %772 = vadd.xlane.f32.xlu0 %v771_v51 }
 0x27f   : > { %1096 = vrot.lane.b32.xlu0 %v1931_v54, %s1745_s16 }
 0x2cb   : > { %v880_v56 = vpop.xlane.xlu1 %879 }
 0x2cc   : > { %v881_v57 = vsub.f32 %v873_v38, %v880_v56 }
 0x2ce   : > { %v882_v58 = vmul.f32 1.442695, %v881_v57 }
 0x2d0   : > { %1702 = vpow2.f32 %v882_v58 }
 0x2da   : > { %v1703_v59 = vpop.eup %1702 }
 0x2db   : > { %v884_v60 = vsel %vm718_vm2, %v1703_v59, 0.0 }
 0x2dc   : > { %885 = vadd.xlane.f32.xlu1 %v884_v60 }
 0x2ed   : > { %891 = vrot.lane.b32.xlu1 %v1931_v54, %s1744_s18 }
 0x2f1   : > { %1036 = vrot.lane.b32.xlu1 %v1886_v18, %s1745_s16 }
 0x2f5   : > { %1034 = vrot.lane.b32.xlu1 %v1890_v22, %s1745_s16 }
 0x2f6   : > { %v773_v61 = vpop.xlane.xlu0 %772 }
 0x2f7   : > { %1704 = vrcp.f32 %v773_v61 }
 0x2fa   : > { %v1097_v13 = vpop.permute.xlu0 %1096 }
 0x2fb   : > { %v1102_v19 = vsel %vm780_vm3, %v1097_v13, 0 }
 0x301   : > { %v1705_v62 = vpop.eup %1704 }
 0x302   : > { %v775_v63 = vmul.f32 %v1705_v62, %v1701_v50 }
 0x304   : > { %v776_v0 = vpack.c.bf16 %v775_v63, %v775_v63 }
 0x306   : > { %1602 = vmatmul.mubr.msk.bf16.vlgmr.msra.gmra.mrb[8].mxu0 %vm718_vm2, %v776_v0 }
 0x307   : > { %1613 = vmatprep.mubr.msk.bf16.mxu0 %vm1743_vm0, %v1742_v1 }
 0x369   : > { %v886_v4 = vpop.xlane.xlu1 %885 }
 0x36a   : > { %1706 = vrcp.f32 %v886_v4 }
 0x36d   : > { %v892_v5 = vpop.permute.xlu1 %891 }
 0x36e   : > { %v897_v6 = vsel %vm780_vm3, %v892_v5, 0 }
 0x36f   : > { %1612 = vmatpush3.bf16.msra.mxu0 %v897_v6 }
 0x370   : > { %1623 = vmatprep.subr.bf16.mxu0 %v1742_v1 }
 0x371   : > { %v1037_v21 = vpop.permute.xlu1 %1036 }
 0x372   : > { %v1042_v27 = vsel %vm718_vm2, %v1037_v21, 0 }
 0x374   : > { %v1707_v8 = vpop.eup %1706 }
 0x375   : > { %v888_v10 = vmul.f32 %v1707_v8, %v1703_v59  ;;  %v1035_v29 = vpop.permute.xlu1 %1034 }
 0x377   : > { %v889_v11 = vpack.c.bf16 %v888_v10, %v888_v10 }
 0x379   : > { %1614 = vmatmul.mubr.msk.bf16.vlgmr.msra.gmra.mrb[12].mxu0 %vm718_vm2, %v889_v11 }
 0x37a   : > { %1624 = vmatpush3.bf16.msra.mxu0 %v992_v12  ;;  %1625 = vmatprep.mubr.msk.bf16.mxu0 %vm1743_vm0, %v1742_v1 }
 0x37b   : > { %1635 = vmatprep.subr.bf16.mxu0 %v1742_v1 }
 0x3d9   : > { %v818_v14 = vpop.f32.mrb[8].mxu0 }
 0x3da   : > { %v824_v15 = vpack.c.bf16 %v818_v14, %v818_v14  ;;  %v1603_v16 = vpop.f32.mrb[9].mxu0 }
 0x3db   : > { %v821_v17 = vpop.f32.mrb[10].mxu0 }
 0x3dc   : > { %v1604_v20 = vpop.f32.mrb[11].mxu0  ;;  %1626 = vmatmul.mubr.msk.bf16.vlgmr.msra.gmra.mrb[16].mxu0 %vm718_vm2, %v824_v15 }
 0x3dd   : > { %1636 = vmatpush3.bf16.msra.mxu0 %v1102_v19  ;;  %1637 = vmatprep.mubr.msk.bf16.mxu0 %vm1743_vm0, %v1742_v1 }
 0x3de   : > { %1647 = vmatprep.subr.bf16.mxu0 %v1742_v1 }
 0x44c   : > { %v933_v23 = vpop.f32.mrb[12].mxu0 }
 0x44d   : > { %v939_v24 = vpack.c.bf16 %v933_v23, %v933_v23  ;;  %v1615_v25 = vpop.f32.mrb[13].mxu0 }
 0x44e   : > { %v936_v26 = vpop.f32.mrb[14].mxu0 }
 0x44f   : > { %v1616_v28 = vpop.f32.mrb[15].mxu0  ;;  %1620 = vmatmul.mubr.msk.bf16.vlgmr.msra.gmra.mrb[12].mxu1 %vm718_vm2, %v939_v24 }
 0x450   : > { %1630 = vmatpush3.bf16.xpose.msra.mxu1 %v1042_v27  ;;  %1631 = vmatprep.mubr.msk.bf16.mxu1 %vm1743_vm0, %v1742_v1 }
 0x451   : > { %1641 = vmatprep.subr.bf16.mxu1 %v1742_v1 }
 0x457   : > { %1632 = vmatmul.mubr.msk.bf16.vlgmr.msra.gmra.mrb[16].mxu1 %vm718_vm2, %v1035_v29 }
 0x458   : > { %1643 = vmatprep.mubr.msk.bf16.mxu1 %vm1743_vm0, %v1742_v1 }
 0x4af   : > { %v1028_v31 = vpop.f32.mrb[16].mxu0 }
 0x4b0   : > { %v1627_v32 = vpop.f32.mrb[17].mxu0 }
 0x4b1   : > { %v1031_v33 = vpop.f32.mrb[18].mxu0  ;;  %v1531_v32 = vld [vmem:[%s2047_s10] ss:$0 sm:$0xff] }
 0x4b2   : > { %v1628_v34 = vpop.f32.mrb[19].mxu0 }
 0x522   : > { %v982_v35 = vpop.f32.mrb[12].mxu1 }
 0x523   : > { %v1973_v36 = vadd.f32 %v1028_v31, %v982_v35  ;;  %v1621_v37 = vpop.f32.mrb[13].mxu1 }
 0x524   : > { %v985_v38 = vpop.f32.mrb[14].mxu1 }
 0x525   : > { %v1622_v39 = vpop.f32.mrb[15].mxu1 }
 0x52a   : > { %v1078_v40 = vpop.f32.mrb[16].mxu1 }
 0x52b   : > { %v1079_v41 = vadd.f32 %v1078_v40, %v1921_v30  ;;  %v1633_v42 = vpop.f32.mrb[17].mxu1 }
 0x52c   : > { %v1081_v43 = vpop.f32.mrb[18].mxu1 }
 0x52d   : > { %v1634_v44 = vpop.f32.mrb[19].mxu1  ;;  %v1084_v45 = vsel %vm718_vm2, %v1079_v41, -inf }
 0x52e   : > { %1085 = vmax.xlane.f32.xlu1 %v1084_v45 }
 0x5bb   : > { %v1086_v46 = vpop.xlane.xlu1 %1085 }
 0x5bc   : > { %v1087_v47 = vsub.f32 %v1079_v41, %v1086_v46 }
 0x5be   : > { %v1088_v48 = vmul.f32 1.442695, %v1087_v47 }
 0x5c0   : > { %1708 = vpow2.f32 %v1088_v48 }
 0x5ca   : > { %v1709_v49 = vpop.eup %1708 }
 0x5cb   : > { %v1090_v50 = vsel %vm718_vm2, %v1709_v49, 0.0 }
 0x5cc   : > { %1091 = vadd.xlane.f32.xlu0 %v1090_v50  ;;  %v1533_v50 = vld [vmem:[%s2049_s12] ss:$0 sm:$0xff] }
 0x5e2   : > { %1196 = vrot.lane.b32.xlu0 %v1886_v18, %s1746_s22 }
 0x5e6   : > { %1194 = vrot.lane.b32.xlu0 %v1890_v22, %s1746_s22  ;;  %v1525_v22 = vld [vmem:[%s2046_s9 + $0x8] sm:$0xf] }
 0x5e7   : > { %v1151_v58 = vsel %vm780_vm3, %v1525_v22, 0 }
 0x5e8   : > { %1642 = vmatpush3.bf16.msra.mxu1 %v1151_v58 }
 0x5e9   : > { %1653 = vmatprep.subr.bf16.mxu1 %v1742_v1 }
 0x659   : > { %v1092_v51 = vpop.xlane.xlu0 %1091 }
 0x65a   : > { %1710 = vrcp.f32 %v1092_v51 }
 0x65d   : > { %v1197_v55 = vpop.permute.xlu0 %1196 }
 0x65e   : > { %v1202_v57 = vsel %vm718_vm2, %v1197_v55, 0 }
 0x661   : > { %v1195_v18 = vpop.permute.xlu0 %1194 }
 0x664   : > { %v1711_v52 = vpop.eup %1710 }
 0x665   : > { %v1094_v53 = vmul.f32 %v1711_v52, %v1709_v49 }
 0x667   : > { %v1095_v56 = vpack.c.bf16 %v1094_v53, %v1094_v53 }
 0x669   : > { %1638 = vmatmul.mubr.msk.bf16.vlgmr.msra.gmra.mrb[20].mxu0 %vm718_vm2, %v1095_v56 }
 0x66a   : > { %1648 = vmatpush3.bf16.xpose.msra.mxu0 %v1202_v57  ;;  %1649 = vmatprep.mubr.msk.bf16.mxu0 %vm1743_vm0, %v1742_v1 }
 0x66b   : > { %1659 = vmatprep.subr.bf16.mxu0 %v1742_v1 }
 0x671   : > { %1650 = vmatmul.mubr.msk.bf16.vlgmr.msra.gmra.mrb[24].mxu0 %vm718_vm2, %v1195_v18 }
 0x672   : > { %1661 = vmatprep.mubr.msk.bf16.mxu0 %vm1743_vm0, %v1742_v1 }
 0x73c   : > { %v1138_v59 = vpop.f32.mrb[20].mxu0 }
 0x73d   : > { %v1144_v60 = vpack.c.bf16 %v1138_v59, %v1138_v59  ;;  %v1639_v61 = vpop.f32.mrb[21].mxu0 }
 0x73e   : > { %v1141_v62 = vpop.f32.mrb[22].mxu0 }
 0x73f   : > { %v1640_v63 = vpop.f32.mrb[23].mxu0  ;;  %1644 = vmatmul.mubr.msk.bf16.vlgmr.msra.gmra.mrb[20].mxu1 %vm718_vm2, %v1144_v60 }
 0x740   : > { %1655 = vmatprep.mubr.msk.bf16.mxu1 %vm1743_vm0, %v1742_v1  ;;  %v1529_v1 = vld [vmem:[%s2046_s9 + $0xc] sm:$0xf] }
 0x744   : > { %v1238_v0 = vpop.f32.mrb[24].mxu0 }
 0x745   : > { %v1239_v2 = vadd.f32 %v1238_v0, %v1921_v30  ;;  %v1651_v3 = vpop.f32.mrb[25].mxu0  ;;  %v1311_v30 = vsel %vm780_vm3, %v1529_v1, 0 }
 0x746   : > { %v1241_v4 = vpop.f32.mrb[26].mxu0  ;;  %1660 = vmatpush3.bf16.msra.mxu0 %v1311_v30 }
 0x747   : > { %v1652_v5 = vpop.f32.mrb[27].mxu0  ;;  %v1244_v6 = vsel %vm718_vm2, %v1239_v2, -inf }
 0x748   : > { %1245 = vmax.xlane.f32.xlu0 %v1244_v6 }
 0x7d5   : > { %v1246_v8 = vpop.xlane.xlu0 %1245 }
 0x7d6   : > { %v1247_v9 = vsub.f32 %v1239_v2, %v1246_v8 }
 0x7d8   : > { %v1248_v10 = vmul.f32 1.442695, %v1247_v9 }
 0x7da   : > { %1712 = vpow2.f32 %v1248_v10 }
 0x7e4   : > { %v1713_v11 = vpop.eup %1712 }
 0x7e5   : > { %v1250_v12 = vsel %vm718_vm2, %v1713_v11, 0.0 }
 0x7e6   : > { %1251 = vadd.xlane.f32.xlu1 %v1250_v12 }
 0x7f7   : > { %1256 = vrot.lane.b32.xlu1 %v1931_v54, %s1746_s22  ;;  %s511_s22 = scalar_lea.vmem %s2050_s13, %s1858_s20 }
 0x812   : > { %v1187_v13 = vpop.f32.mrb[20].mxu1 }
 0x813   : > { %v1193_v14 = vadd.f32 %v1187_v13, %v1973_v36  ;;  %v1645_v15 = vpop.f32.mrb[21].mxu1 }
 0x814   : > { %v1190_v16 = vpop.f32.mrb[22].mxu1 }
 0x815   : > { %v1646_v17 = vpop.f32.mrb[23].mxu1 }
 0x873   : > { %v1252_v19 = vpop.xlane.xlu1 %1251 }
 0x874   : > { %1714 = vrcp.f32 %v1252_v19 }
 0x877   : > { %v1257_v20 = vpop.permute.xlu1 %1256 }
 0x878   : > { %v1262_v21 = vsel %vm780_vm3, %v1257_v20, 0 }
 0x879   : > { %1654 = vmatpush3.bf16.msra.mxu1 %v1262_v21 }
 0x87e   : > { %v1715_v54 = vpop.eup %1714 }
 0x87f   : > { %v1254_v23 = vmul.f32 %v1715_v54, %v1713_v11 }
 0x881   : > { %v1255_v24 = vpack.c.bf16 %v1254_v23, %v1254_v23 }
 0x883   : > { %1656 = vmatmul.mubr.msk.bf16.vlgmr.msra.gmra.mrb[24].mxu1 %vm718_vm2, %v1255_v24 }
 0x956   : > { %v1298_v25 = vpop.f32.mrb[24].mxu1 }
 0x957   : > { %v1304_v26 = vpack.c.bf16 %v1298_v25, %v1298_v25  ;;  %v1657_v27 = vpop.f32.mrb[25].mxu1 }
 0x958   : > { %v1301_v28 = vpop.f32.mrb[26].mxu1 }
 0x959   : > { %v1658_v29 = vpop.f32.mrb[27].mxu1  ;;  %1662 = vmatmul.mubr.msk.bf16.vlgmr.msra.gmra.mrb[28].mxu0 %vm718_vm2, %v1304_v26 }
 0xa2c   : > { %v1347_v31 = vpop.f32.mrb[28].mxu0 }
 0xa2d   : > { %v1353_v33 = vadd.f32 %v1347_v31, %v1193_v14  ;;  %v1663_v34 = vpop.f32.mrb[29].mxu0 }
 0xa2e   : > { %v1350_v35 = vpop.f32.mrb[30].mxu0 }
 0xa2f   : > { %v1361_v36 = vadd.f32 %v1531_v32, %v1353_v33  ;;  %v1664_v37 = vpop.f32.mrb[31].mxu0 }
 0xa31   : > { %v1362_v38 = vadd.f32 %v1361_v36, %v1869_v7  ;;  %v1532_v7 = vld [vmem:[%s2048_s11] ss:$0 sm:$0xff] }
 0xa33   : > { %v1365_v39 = vsel %vm542_vm1, %v1362_v38, 0.0 }
 0xa34   : > { %1366 = vadd.xlane.f32.xlu1 %v1365_v39 }
 0xac1   : > { %v1367_v40 = vpop.xlane.xlu1 %1366 }
 0xac2   : > { %v1369_v41 = vmul.f32 0.03125, %v1367_v40 }
 0xac4   : > { %v1370_v42 = vsub.f32 %v1362_v38, %v1369_v41 }
 0xac6   : > { %v1371_v43 = vmul.f32 %v1370_v42, %v1370_v42 }
 0xac8   : > { %v1372_v44 = vsel %vm542_vm1, %v1371_v43, 0.0 }
 0xac9   : > { %1373 = vadd.xlane.f32.xlu0 %v1372_v44 }
 0xb56   : > { %v1374_v45 = vpop.xlane.xlu0 %1373 }
 0xb57   : > { %v1375_v46 = vmul.f32 0.03125, %v1374_v45 }
 0xb59   : > { %v1376_v47 = vadd.f32 1e-12, %v1375_v46 }
 0xb5b   : > { %1716 = vrsqrt.f32 %v1376_v47 }
 0xb65   : > { %v1717_v48 = vpop.eup %1716 }
 0xb66   : > { %v1378_v49 = vmul.f32 %v1717_v48, %v1370_v42 }
 0xb68   : > { %v1385_v51 = vmul.f32 %v1532_v7, %v1378_v49 }
 0xb6a   : > { %v1392_v52 = vadd.f32 %v1533_v50, %v1385_v51 }
 0xb6c   : > { %1393 = vst.msk [vmem:[%s511_s22] sm:$0xff] %vm542_vm1, %v1392_v52 }
 0xb6d PF: > { %s23_s27 = sadd.s32 1, %s1740_s27   ;;  %s2051_s25 = smov %s1736_s26 }
 0xb6e   : > { %p20_p5 = scmp.ge.s32.totalorder %s23_s27, 4   ;;  %s2052_s26 = smov %s2054_s28 }
 0xb70   :  { %22 = sbr.rel (!%p20_p5) target bundleno = 2 (0x2), region = 111 }

</bundles_post_ra>
